<compile_context>
chip_gen: v7x
topology: tpu7x:2x2x1
jax: 0.10.0
libtpu: 0.0.40
codegen_flags: <defaults>
</compile_context>

<pallas_src>
import functools

import jax
import jax.numpy as jnp
from jax.experimental import pallas as pl
from jax.experimental.pallas import tpu as pltpu

EXPANSION = 1  # BasicBlock.expansion
BN_EPS = 1e-5


# ----------------------------------------------------------------------------
# Pass 1: tiled matmul (MXU) + per-channel sum / sum-of-squares accumulation
# ----------------------------------------------------------------------------
def _mm_stats_kernel(p_ref, w_ref, y_ref, sum_ref, ssq_ref, acc_ref):
    # grid = (nN, nM, nK): j = Cout tile (parallel), i = M tile, k = K tile.
    # p_ref:   (tm, tk)  bf16 im2col patches
    # w_ref:   (tk, tn)  bf16 weights
    # y_ref:   (tm, tn)  f32 pre-BN conv output
    # sum_ref: (1, tn)   f32 per-channel sum   (resident across all i, k)
    # ssq_ref: (1, tn)   f32 per-channel sumsq (resident across all i, k)
    # acc_ref: (tm, tn)  f32 K-reduction accumulator scratch
    i = pl.program_id(1)
    k = pl.program_id(2)
    last_k = k == pl.num_programs(2) - 1

    @pl.when(k == 0)
    def _():
        acc_ref[...] = jnp.zeros_like(acc_ref)

    acc_ref[...] += jnp.dot(p_ref[...], w_ref[...],
                            preferred_element_type=jnp.float32)

    @pl.when(last_k)
    def _():
        y_ref[...] = acc_ref[...]

    # Zero-padded M rows produce y == 0 and therefore do not perturb the sums;
    # the true element count is divided out in the (tiny) JAX glue.
    @pl.when(last_k & (i == 0))
    def _():
        y = acc_ref[...]
        sum_ref[...] = jnp.sum(y, axis=0, keepdims=True)
        ssq_ref[...] = jnp.sum(y * y, axis=0, keepdims=True)

    @pl.when(last_k & (i != 0))
    def _():
        y = acc_ref[...]
        sum_ref[...] = sum_ref[...] + jnp.sum(y, axis=0, keepdims=True)
        ssq_ref[...] = ssq_ref[...] + jnp.sum(y * y, axis=0, keepdims=True)


# ----------------------------------------------------------------------------
# Pass 2: folded scale/shift (+ residual) (+ ReLU) epilogue
# ----------------------------------------------------------------------------
def _epilogue_kernel(y_ref, scale_ref, shift_ref, o_ref, *, relu):
    y = y_ref[...] * scale_ref[...] + shift_ref[...]
    if relu:
        y = jnp.maximum(y, 0.0)
    o_ref[...] = y.astype(o_ref.dtype)


def _epilogue_res_kernel(y_ref, scale_ref, shift_ref, res_ref, o_ref, *, relu):
    y = y_ref[...] * scale_ref[...] + shift_ref[...]
    y = y + res_ref[...].astype(jnp.float32)
    if relu:
        y = jnp.maximum(y, 0.0)
    o_ref[...] = y.astype(o_ref.dtype)


# ----------------------------------------------------------------------------
# JAX glue: im2col (data movement only), padding, pallas_call wrappers
# ----------------------------------------------------------------------------
def _round_up(x, m):
    return ((x + m - 1) // m) * m


def _choose_tile(dim, target, align):
    """Return (tile, padded_dim) with tile | padded_dim, tile % align == 0."""
    padded = _round_up(dim, align)
    if padded <= target:
        return padded, padded
    return target, _round_up(dim, target)


def _im2col(x, kh, kw, stride, pad):
    # x: (N, H, W, C) NHWC (bf16)
    if pad:
        x = jnp.pad(x, ((0, 0), (pad, pad), (pad, pad), (0, 0)))
    n, hp, wp, c = x.shape
    oh = (hp - kh) // stride + 1
    ow = (wp - kw) // stride + 1
    cols = []
    for i in range(kh):
        for j in range(kw):
            sl = jax.lax.slice(
                x,
                (0, i, j, 0),
                (n, i + (oh - 1) * stride + 1, j + (ow - 1) * stride + 1, c),
                (1, stride, stride, 1),
            )
            cols.append(sl)  # (n, oh, ow, c)
    patches = jnp.stack(cols, axis=3)                    # (n, oh, ow, kh*kw, c)
    return patches.reshape(n * oh * ow, kh * kw * c), (n, oh, ow)


def conv_bn_act(x, w, gamma, beta, *, stride=1, pad=0, residual=None,
                apply_bn=True, apply_relu=True, out_dtype=jnp.bfloat16):
    """x: (N,H,W,Cin) NHWC;  w: (Cout,Cin,KH,KW) torch layout (fp32 params)."""
    cout, cin, kh, kw = w.shape
    patches, (n, oh, ow) = _im2col(x.astype(jnp.bfloat16), kh, kw, stride, pad)
    w2d = jnp.transpose(w, (2, 3, 1, 0)).reshape(kh * kw * cin, cout)
    w2d = w2d.astype(jnp.bfloat16)

    m, kdim = patches.shape
    tm, mp = _choose_tile(m, 256, 8)        # M (sublane) tile
    tk, kp = _choose_tile(kdim, 256, 128)   # K tile (MXU-aligned)
    tn, np_ = _choose_tile(cout, 256, 128)  # Cout (lane) tile, lane-dense

    patches_p = jnp.pad(patches, ((0, mp - m), (0, kp - kdim)))
    w2d_p = jnp.pad(w2d, ((0, kp - kdim), (0, np_ - cout)))

    # ---- pass 1: tiled matmul + per-channel stats --------------------------
    grid_mm = (np_ // tn, mp // tm, kp // tk)
    y, ch_sum, ch_ssq = pl.pallas_call(
        _mm_stats_kernel,
        out_shape=(jax.ShapeDtypeStruct((mp, np_), jnp.float32),
                   jax.ShapeDtypeStruct((1, np_), jnp.float32),
                   jax.ShapeDtypeStruct((1, np_), jnp.float32)),
        grid_spec=pltpu.PrefetchScalarGridSpec(
            num_scalar_prefetch=0,
            grid=grid_mm,
            in_specs=[pl.BlockSpec((tm, tk), lambda j, i, k: (i, k)),
                      pl.BlockSpec((tk, tn), lambda j, i, k: (k, j))],
            out_specs=(pl.BlockSpec((tm, tn), lambda j, i, k: (i, j)),
                       pl.BlockSpec((1, tn), lambda j, i, k: (0, j)),
                       pl.BlockSpec((1, tn), lambda j, i, k: (0, j))),
            scratch_shapes=[pltpu.VMEM((tm, tn), jnp.float32)]),
        compiler_params=pltpu.CompilerParams(
            dimension_semantics=("parallel", "arbitrary", "arbitrary")),
    )(patches_p, w2d_p)

    # ---- tiny per-channel folding (O(Cout) glue) ---------------------------
    gamma_p = jnp.pad(gamma.astype(jnp.float32), (0, np_ - cout),
                      constant_values=1.0)
    beta_p = jnp.pad(beta.astype(jnp.float32), (0, np_ - cout))
    if apply_bn:
        inv_m = 1.0 / float(m)                      # true (unpadded) count
        mean = ch_sum[0] * inv_m
        var = jnp.maximum(ch_ssq[0] * inv_m - mean * mean, 0.0)  # biased var
        scale = gamma_p * jax.lax.rsqrt(var + BN_EPS)
        shift = beta_p - mean * scale
    else:
        scale = gamma_p                              # ones
        shift = beta_p                               # conv bias
    scale = scale.reshape(1, np_)
    shift = shift.reshape(1, np_)

    # ---- pass 2: normalize / affine / residual / relu ----------------------
    grid_ep = (mp // tm, np_ // tn)
    ep_params = pltpu.CompilerParams(
        dimension_semantics=("parallel", "parallel"))
    tile_spec = pl.BlockSpec((tm, tn), lambda i, j: (i, j))
    vec_spec = pl.BlockSpec((1, tn), lambda i, j: (0, j))

    if residual is None:
        out_p = pl.pallas_call(
            functools.partial(_epilogue_kernel, relu=apply_relu),
            out_shape=jax.ShapeDtypeStruct((mp, np_), out_dtype),
            grid_spec=pltpu.PrefetchScalarGridSpec(
                num_scalar_prefetch=0, grid=grid_ep,
                in_specs=[tile_spec, vec_spec, vec_spec],
                out_specs=tile_spec),
            compiler_params=ep_params,
        )(y, scale, shift)
    else:
        res2d = residual.reshape(m, cout).astype(jnp.bfloat16)
        res_p = jnp.pad(res2d, ((0, mp - m), (0, np_ - cout)))
        out_p = pl.pallas_call(
            functools.partial(_epilogue_res_kernel, relu=apply_relu),
            out_shape=jax.ShapeDtypeStruct((mp, np_), out_dtype),
            grid_spec=pltpu.PrefetchScalarGridSpec(
                num_scalar_prefetch=0, grid=grid_ep,
                in_specs=[tile_spec, vec_spec, vec_spec, tile_spec],
                out_specs=tile_spec),
            compiler_params=ep_params,
        )(y, scale, shift, res_p)

    return out_p[:m, :cout].reshape(n, oh, ow, cout)


# ----------------------------------------------------------------------------
# Model structure (mirrors ResNet._make_layer / BasicBlock / PoseResNet.forward)
# ----------------------------------------------------------------------------
def basic_block(x, p):
    identity = x
    out = conv_bn_act(x, p['conv1_w'], p['bn1_g'], p['bn1_b'],
                      stride=p['stride'], pad=1,
                      apply_bn=True, apply_relu=True)
    if 'ds_w' in p:
        identity = conv_bn_act(x, p['ds_w'], p['ds_bn_g'], p['ds_bn_b'],
                               stride=p['stride'], pad=0,
                               apply_bn=True, apply_relu=False)
    # relu(bn2(conv2(out)) + identity)
    out = conv_bn_act(out, p['conv2_w'], p['bn2_g'], p['bn2_b'],
                      stride=1, pad=1, residual=identity,
                      apply_bn=True, apply_relu=True)
    return out


def init_params(key, cfg, in_channels=3, num_out=4):
    keys = list(jax.random.split(key, 128))
    kit = iter(keys)

    def conv_w(cout, cin, kh, kw):
        return jax.random.normal(next(kit), (cout, cin, kh, kw),
                                 jnp.float32) * 0.001

    params = {
        'stem_w': conv_w(64, in_channels, 7, 7),
        'stem_bn_g': jnp.ones((64,), jnp.float32),
        'stem_bn_b': jnp.zeros((64,), jnp.float32),
    }

    inplanes = 64
    layers = []
    offset = len(cfg['channels']) - len(cfg['blocks'])
    for i in range(len(cfg['blocks'])):
        planes = cfg['channels'][offset + i]
        nblocks = cfg['blocks'][i]
        layer_stride = 2 if i < len(cfg['blocks']) - 1 else 1
        blocks = []
        for b in range(nblocks):
            s = layer_stride if b == 0 else 1
            bp = {
                'stride': s,
                'conv1_w': conv_w(planes, inplanes, 3, 3),
                'bn1_g': jnp.ones((planes,), jnp.float32),
                'bn1_b': jnp.zeros((planes,), jnp.float32),
                'conv2_w': conv_w(planes, planes, 3, 3),
                'bn2_g': jnp.ones((planes,), jnp.float32),
                'bn2_b': jnp.zeros((planes,), jnp.float32),
            }
            if s != 1 or inplanes != planes * EXPANSION:
                bp['ds_w'] = conv_w(planes * EXPANSION, inplanes, 1, 1)
                bp['ds_bn_g'] = jnp.ones((planes * EXPANSION,), jnp.float32)
                bp['ds_bn_b'] = jnp.zeros((planes * EXPANSION,), jnp.float32)
            inplanes = planes * EXPANSION
            blocks.append(bp)
        layers.append(blocks)
    params['layers'] = layers

    # last_layer: Conv2d(512, num_out, 3) with bias, default (uniform) init.
    fan_in = 512 * 3 * 3
    bound = 1.0 / (fan_in ** 0.5)
    params['last_w'] = jax.random.uniform(next(kit), (num_out, 512, 3, 3),
                                          jnp.float32, -bound, bound)
    params['last_b'] = jax.random.uniform(next(kit), (num_out,),
                                          jnp.float32, -bound, bound)
    return params


def pose_resnet_forward(x_nchw, params):
    # NCHW (PyTorch) -> NHWC (kernel layout), bf16 activations internally.
    x = jnp.transpose(x_nchw, (0, 2, 3, 1)).astype(jnp.bfloat16)

    # backbone stem: conv7x7 s1 p3 -> BN -> ReLU
    x = conv_bn_act(x, params['stem_w'], params['stem_bn_g'], params['stem_bn_b'],
                    stride=1, pad=3, apply_bn=True, apply_relu=True)

    # residual layers
    for blocks in params['layers']:
        for bp in blocks:
            x = basic_block(x, bp)

    # head: conv3x3, stride 1, no padding, with bias (no BN, no ReLU), fp32 out
    ones = jnp.ones((params['last_w'].shape[0],), jnp.float32)
    x = conv_bn_act(x, params['last_w'], ones, params['last_b'],
                    stride=1, pad=0, apply_bn=False, apply_relu=False,
                    out_dtype=jnp.float32)

    # back to NCHW
    return jnp.transpose(x, (0, 3, 1, 2))


if __name__ == "__main__":
    # Small config consistent with the module: backbone must end at 512 channels
    # because last_layer expects in_channels=512.
    cfg = {'block': 'BasicBlock', 'channels': [64, 256, 512], 'blocks': [1, 1]}

    key = jax.random.PRNGKey(0)
    kp, kx = jax.random.split(key)
    params = init_params(kp, cfg, in_channels=3, num_out=4)

    x = jax.random.normal(kx, (2, 3, 16, 16), jnp.float32)  # NCHW like PyTorch

    out = pose_resnet_forward(x, params)
    out = jax.block_until_ready(out)

    # 16x16 -> stem 16x16 -> layer0 (stride 2) 8x8 -> layer1 8x8 -> head 3x3 p0 -> 6x6
    assert out.shape == (2, 4, 6, 6), out.shape
    assert jnp.all(jnp.isfinite(out))
    print("KERNEL_OK")
</pallas_src>

<mosaic_0001>
module attributes {stable_mosaic.version = 11 : i64} {
  func.func @_mm_stats_kernel(%arg0: i32, %arg1: i32, %arg2: i32, %arg3: memref<256x256xbf16, #tpu.memory_space<vmem>>, %arg4: memref<256x128xbf16, #tpu.memory_space<vmem>>, %arg5: memref<256x128xf32, #tpu.memory_space<vmem>>, %arg6: memref<1x128xf32, #tpu.memory_space<vmem>>, %arg7: memref<1x128xf32, #tpu.memory_space<vmem>>, %arg8: memref<256x128xf32, #tpu.memory_space<vmem>>) attributes {dimension_semantics = [#tpu.dimension_semantics<parallel>, #tpu.dimension_semantics<arbitrary>, #tpu.dimension_semantics<arbitrary>], iteration_bounds = array<i64: 1, 2, 1>, scalar_prefetch = 0 : i64, scratch_operands = 1 : i64, tpu.core_type = #tpu.core_type<tc>, window_params = [{transform_indices = @transform_0, window_bounds = array<i64: 256, 256>}, {transform_indices = @transform_1, window_bounds = array<i64: 256, 128>}, {transform_indices = @transform_2, window_bounds = array<i64: 256, 128>}, {transform_indices = @transform_3, window_bounds = array<i64: 1, 128>}, {transform_indices = @transform_4, window_bounds = array<i64: 1, 128>}]} {
    %c0_i32 = arith.constant 0 : i32
    %0 = arith.cmpi eq, %arg2, %c0_i32 : i32
    %c0_i32_0 = arith.constant 0 : i32
    %1 = arith.cmpi eq, %arg2, %c0_i32_0 : i32
    %2 = arith.extui %1 : i1 to i32
    %c0_i32_1 = arith.constant 0 : i32
    %3 = arith.cmpi ne, %2, %c0_i32_1 : i32
    scf.if %3 {
      %cst_14 = arith.constant 0.000000e+00 : f32
      %20 = vector.broadcast %cst_14 : f32 to vector<256x128xf32>
      %c0_15 = arith.constant 0 : index
      %c0_16 = arith.constant 0 : index
      %21 = vector.load %arg8[%c0_15, %c0_16] : memref<256x128xf32, #tpu.memory_space<vmem>>, vector<256x128xf32>
      tpu.vector_store %arg8[%c0_15, %c0_16], %20 {strides = array<i32>} : memref<256x128xf32, #tpu.memory_space<vmem>>, vector<256x128xf32>,
    } else {
    }
    %c0 = arith.constant 0 : index
    %c0_2 = arith.constant 0 : index
    %4 = vector.load %arg8[%c0, %c0_2] : memref<256x128xf32, #tpu.memory_space<vmem>>, vector<256x128xf32>
    %c0_3 = arith.constant 0 : index
    %c0_4 = arith.constant 0 : index
    %5 = vector.load %arg3[%c0_3, %c0_4] : memref<256x256xbf16, #tpu.memory_space<vmem>>, vector<256x256xbf16>
    %c0_5 = arith.constant 0 : index
    %c0_6 = arith.constant 0 : index
    %6 = vector.load %arg4[%c0_5, %c0_6] : memref<256x128xbf16, #tpu.memory_space<vmem>>, vector<256x128xbf16>
    %cst = arith.constant dense<0.000000e+00> : vector<256x128xf32>
    %7 = tpu.matmul %5, %6, %cst {dimension_numbers = #tpu.dot_dimension_numbers<[1], [0], [0], [1], [0, 0, 1, 1], [], []>} : vector<256x256xbf16>, vector<256x128xbf16>, vector<256x128xf32> -> vector<256x128xf32>
    %8 = arith.addf %4, %7 : vector<256x128xf32>
    %c0_7 = arith.constant 0 : index
    %c0_8 = arith.constant 0 : index
    %9 = vector.load %arg8[%c0_7, %c0_8] : memref<256x128xf32, #tpu.memory_space<vmem>>, vector<256x128xf32>
    tpu.vector_store %arg8[%c0_7, %c0_8], %8 {strides = array<i32>} : memref<256x128xf32, #tpu.memory_space<vmem>>, vector<256x128xf32>,
    %10 = arith.extui %0 : i1 to i32
    %c0_i32_9 = arith.constant 0 : i32
    %11 = arith.cmpi ne, %10, %c0_i32_9 : i32
    scf.if %11 {
      %c0_14 = arith.constant 0 : index
      %c0_15 = arith.constant 0 : index
      %20 = vector.load %arg8[%c0_14, %c0_15] : memref<256x128xf32, #tpu.memory_space<vmem>>, vector<256x128xf32>
      %c0_16 = arith.constant 0 : index
      %c0_17 = arith.constant 0 : index
      %21 = vector.load %arg5[%c0_16, %c0_17] : memref<256x128xf32, #tpu.memory_space<vmem>>, vector<256x128xf32>
      tpu.vector_store %arg5[%c0_16, %c0_17], %20 {strides = array<i32>} : memref<256x128xf32, #tpu.memory_space<vmem>>, vector<256x128xf32>,
    } else {
    }
    %c0_i32_10 = arith.constant 0 : i32
    %12 = arith.cmpi eq, %arg1, %c0_i32_10 : i32
    %13 = arith.andi %0, %12 : i1
    %14 = arith.extui %13 : i1 to i32
    %c0_i32_11 = arith.constant 0 : i32
    %15 = arith.cmpi ne, %14, %c0_i32_11 : i32
    scf.if %15 {
      %c0_14 = arith.constant 0 : index
      %c0_15 = arith.constant 0 : index
      %20 = vector.load %arg8[%c0_14, %c0_15] : memref<256x128xf32, #tpu.memory_space<vmem>>, vector<256x128xf32>
      %cst_16 = arith.constant dense<0.000000e+00> : vector<128xf32>
      %21 = vector.multi_reduction <add>, %20, %cst_16 [0] : vector<256x128xf32> to vector<128xf32>
      %22 = vector.shape_cast %21 : vector<128xf32> to vector<1x128xf32>
      %c0_17 = arith.constant 0 : index
      %c0_18 = arith.constant 0 : index
      %23 = vector.load %arg6[%c0_17, %c0_18] : memref<1x128xf32, #tpu.memory_space<vmem>>, vector<1x128xf32>
      tpu.vector_store %arg6[%c0_17, %c0_18], %22 {strides = array<i32>} : memref<1x128xf32, #tpu.memory_space<vmem>>, vector<1x128xf32>,
      %24 = arith.mulf %20, %20 : vector<256x128xf32>
      %cst_19 = arith.constant dense<0.000000e+00> : vector<128xf32>
      %25 = vector.multi_reduction <add>, %24, %cst_19 [0] : vector<256x128xf32> to vector<128xf32>
      %26 = vector.shape_cast %25 : vector<128xf32> to vector<1x128xf32>
      %c0_20 = arith.constant 0 : index
      %c0_21 = arith.constant 0 : index
      %27 = vector.load %arg7[%c0_20, %c0_21] : memref<1x128xf32, #tpu.memory_space<vmem>>, vector<1x128xf32>
      tpu.vector_store %arg7[%c0_20, %c0_21], %26 {strides = array<i32>} : memref<1x128xf32, #tpu.memory_space<vmem>>, vector<1x128xf32>,
    } else {
    }
    %c0_i32_12 = arith.constant 0 : i32
    %16 = arith.cmpi ne, %arg1, %c0_i32_12 : i32
    %17 = arith.andi %0, %16 : i1
    %18 = arith.extui %17 : i1 to i32
    %c0_i32_13 = arith.constant 0 : i32
    %19 = arith.cmpi ne, %18, %c0_i32_13 : i32
    scf.if %19 {
      %c0_14 = arith.constant 0 : index
      %c0_15 = arith.constant 0 : index
      %20 = vector.load %arg8[%c0_14, %c0_15] : memref<256x128xf32, #tpu.memory_space<vmem>>, vector<256x128xf32>
      %c0_16 = arith.constant 0 : index
      %c0_17 = arith.constant 0 : index
      %21 = vector.load %arg6[%c0_16, %c0_17] : memref<1x128xf32, #tpu.memory_space<vmem>>, vector<1x128xf32>
      %cst_18 = arith.constant dense<0.000000e+00> : vector<128xf32>
      %22 = vector.multi_reduction <add>, %20, %cst_18 [0] : vector<256x128xf32> to vector<128xf32>
      %23 = vector.shape_cast %22 : vector<128xf32> to vector<1x128xf32>
      %24 = arith.addf %21, %23 : vector<1x128xf32>
      %c0_19 = arith.constant 0 : index
      %c0_20 = arith.constant 0 : index
      %25 = vector.load %arg6[%c0_19, %c0_20] : memref<1x128xf32, #tpu.memory_space<vmem>>, vector<1x128xf32>
      tpu.vector_store %arg6[%c0_19, %c0_20], %24 {strides = array<i32>} : memref<1x128xf32, #tpu.memory_space<vmem>>, vector<1x128xf32>,
      %c0_21 = arith.constant 0 : index
      %c0_22 = arith.constant 0 : index
      %26 = vector.load %arg7[%c0_21, %c0_22] : memref<1x128xf32, #tpu.memory_space<vmem>>, vector<1x128xf32>
      %27 = arith.mulf %20, %20 : vector<256x128xf32>
      %cst_23 = arith.constant dense<0.000000e+00> : vector<128xf32>
      %28 = vector.multi_reduction <add>, %27, %cst_23 [0] : vector<256x128xf32> to vector<128xf32>
      %29 = vector.shape_cast %28 : vector<128xf32> to vector<1x128xf32>
      %30 = arith.addf %26, %29 : vector<1x128xf32>
      %c0_24 = arith.constant 0 : index
      %c0_25 = arith.constant 0 : index
      %31 = vector.load %arg7[%c0_24, %c0_25] : memref<1x128xf32, #tpu.memory_space<vmem>>, vector<1x128xf32>
      tpu.vector_store %arg7[%c0_24, %c0_25], %30 {strides = array<i32>} : memref<1x128xf32, #tpu.memory_space<vmem>>, vector<1x128xf32>,
    } else {
    }
    return
  }
  func.func @transform_0(%arg0: i32, %arg1: i32, %arg2: i32) -> (i32, i32) {
    %c0_i32 = arith.constant 0 : i32
    return %arg1, %arg2 : i32, i32
  }
  func.func @transform_1(%arg0: i32, %arg1: i32, %arg2: i32) -> (i32, i32) {
    %c0_i32 = arith.constant 0 : i32
    return %arg2, %arg0 : i32, i32
  }
  func.func @transform_2(%arg0: i32, %arg1: i32, %arg2: i32) -> (i32, i32) {
    %c0_i32 = arith.constant 0 : i32
    return %arg1, %arg0 : i32, i32
  }
  func.func @transform_3(%arg0: i32, %arg1: i32, %arg2: i32) -> (i32, i32) {
    %c0_i32 = arith.constant 0 : i32
    %c0_i32_0 = arith.constant 0 : i32
    return %c0_i32, %arg0 : i32, i32
  }
  func.func @transform_4(%arg0: i32, %arg1: i32, %arg2: i32) -> (i32, i32) {
    %c0_i32 = arith.constant 0 : i32
    %c0_i32_0 = arith.constant 0 : i32
    return %c0_i32, %arg0 : i32, i32
  }
}

</mosaic_0001>

<bundles_post_ra>
// kernel: tpu_custom_call.1
= control target key start
LH: loop header
LB: loop body
LE: loop exit
PB: predicated region body
PF: predicated region fallthrough
CT: control target
= control target key end

     0   :  { %10 = vsyncpa [#allocation4], 0  ;;  %s2359_s0 = inlined_call_operand.hbm [shape: bf16[512,256], index: 0, kind: input, shape index: {}]   ;;  %s2360_s1 = inlined_call_operand.hbm [shape: bf16[256,128], index: 1, kind: input, shape index: {}]   ;;  %s2361_s2 = inlined_call_operand.hbm [shape: f32[512,128], index: 2, kind: output, shape index: {0}]   ;;  %s2362_s3 = inlined_call_operand.hbm [shape: f32[1,128], index: 3, kind: output, shape index: {1}]   ;;  %s2363_s4 = inlined_call_operand.hbm [shape: f32[1,128], index: 4, kind: output, shape index: {2}]  }
   0x1   :  { %12 = vsyncpa [#allocation4 + $0x1], 0 }
   0x2   :  { %13 = vsyncpa [#allocation7], 0 }
   0x3   :  { %14 = vsyncpa [#allocation5], 0 }
   0x4   :  { %16 = vsyncpa [#allocation5 + $0x1], 0 }
   0x5   :  { %17 = vsyncpa [#allocation10], 0  ;;  %s2023_s15 = smov 0   ;;  %s2025_s16 = smov 0  }
   0x6   :  { %s2027_s17 = smov 0   ;;  %s2029_s18 = smov 0  }
   0x7   :  { %s2031_s19 = smov 0   ;;  %s2033_s20 = smov 0  }
   0x8 LB: > { %s1422_s21 = sadd.s32 4294967295, %s1985_s20   ;;  %s1423_s22 = sadd.s32 4294967294, %s1985_s20   ;;  %s1985_s20 = sphi %s2033_s20, %s23_s20   ;;  %s1981_s19 = sphi %s2031_s19, %s2389_s19   ;;  %s1977_s18 = sphi %s2029_s18, %s2388_s18   ;;  %s1973_s17 = sphi %s2027_s17, %s2387_s17   ;;  %s1969_s16 = sphi %s2025_s16, %s2386_s16   ;;  %s1965_s15 = sphi %s2023_s15, %s2385_s15  }
   0x9   : > { %p64_p0 = scmp.ne.s32.totalorder %s1969_s16, %s1965_s15  ;;  %p2057_p1 = scmp.eq.s32.totalorder %s1422_s21, 0 }
   0xa   : > { %p2061_p2 = scmp.eq.s32.totalorder %s1422_s21, 1  ;;  %p124_p3 = scmp.eq.s32.totalorder %s1423_s22, 1 }
   0xb   : > { %s2369_s23 = scalar_select %p2057_p1, 1, 0 }
   0xc   : > { %s2370_s24 = scalar_select %p2061_p2, 1, 0 }
   0xd   : > { %p2067_p4 = por %p2057_p1, %p64_p0  ;;  %p1424_p5 = scmp.ge.s32.totalorder %s1985_s20, 1 }
   0xe   : > { %p2072_p6 = por %p124_p3, %p64_p0  ;;  %p183_p7 = scmp.lt.s32.totalorder %s1985_s20, 3 }
   0xf   : > { %s2371_s25 = scalar_select %p2067_p4, 1, 0 }
  0x10   : > { %s2372_s26 = scalar_select %p2072_p6, 1, 0 }
  0x11   : > { %p2077_p8 = pnand %p1424_p5, %p183_p7  ;;  %s1987_s28 = smov [#allocation6]  }
  0x12   : > { %s199_s29 = sshll.u32 %s1987_s28, 4  ;;  %s38_s5 = sadd.s32 1, %s1981_s19  ;;  %s200_s29 = int_to_ptr.vmem [resolvable:$true] %s199_s29 }
  0x13   : > { %s2373_s27 = scalar_select %p2077_p8, 1, 0 }
  0x14   : > { %p1643_p9 = pneg %p2077_p8  ;;  %s1785_s8 = scalar_lea.hbm %s2360_s1, 2048 }
  0x15   : > { %p1786_p12 = scmp.ne.s32.totalorder %s2360_s1, %s1785_s8  ;;  %p1792_p5 = scmp.lt.u32.totalorder %s1785_s8, %s2360_s1 }
  0x16   : > { %p2086_p11 = pnand %p1643_p9, %p2057_p1 }
  0x18   : > { %p1787_p13 = pneg %p2086_p11 }
  0x1a   : > { %p1788_p0 = pnand %p1787_p13, %p1786_p12 }
  0x1c   : > { %p1789_p3 = pneg %p1788_p0 }
  0x1e   : > { %p1794_p7 = pnand %p1792_p5, %p1789_p3 }
  0x20   : > { %1797 = shalt.err (!%p1794_p7)
}
  0x21   : > { %s1798_s13 = scalar_lea.vmem %s200_s29, 2048  ;;  %p1806_p1 = scmp.lt.s32.totalorder %s200_s29, %s200_s29 }
  0x22   : > { %p1799_p9 = scmp.ne.s32.totalorder %s200_s29, %s1798_s13  ;;  %p1807_p4 = scmp.lt.s32.totalorder %s1798_s13, %s1798_s13 }
  0x24   : > { %p1801_p10 = pnand %p1799_p9, %p1787_p13  ;;  %p1808_p8 = por %p1807_p4, %p1806_p1 }
  0x26   : > { %p1802_p6 = pneg %p1801_p10 }
  0x28   : > { %p1809_p2 = pnand %p1808_p8, %p1802_p6 }
  0x2a   : > { %1812 = shalt.err (!%p1809_p2)
}
  0x2b   : > { %s1988_s14 = smov 64   ;;  %s1989_s21 = smov 4  }
  0x2c   : > { %1646 = dma.hbm_to_vmem [thread:$0]  (!%p2086_p11), %s2360_s1, 2048, %s200_s29, [#allocation7], %s1988_s14, %s1988_s14, %s1989_s21  }
  0x2d   : > { %p40_p1 = scmp.ge.s32.totalorder %s38_s5, 2  ;;  %s51_s6 = sadd.s32 1, %s1973_s17 }
  0x2e   : > { %p58_p2 = scmp.ne.s32.totalorder %s1973_s17, %s1969_s16  ;;  %p59_p4 = scmp.eq.s32.totalorder %s1985_s20, 0 }
  0x2f   : > { %s2391_s5 = smov (%p40_p1, %s38_s5), 0  ;;  %p2376_p8 = scmp.ne.s32.totalorder %s2370_s24, 0 }
  0x30   : > { %p2113_p6 = por %p59_p4, %p58_p2  ;;  %s46_s30 = ssub.s32 %s1981_s19, %s2391_s5 }
  0x31   : > { %p2119_p10 = por %p2376_p8, %p58_p2  ;;  %p1656_p12 = scmp.lt.s32.totalorder %s1985_s20, 2 }
  0x32   : > { %p49_p11 = scmp.eq.s32.totalorder %s46_s30, 0  ;;  %s213_s29 = sand.u32 1, %s1973_s17  }
  0x33   : > { %s1427_s9 = sshll.u32 %s213_s29, 8  ;;  %s1495_s11 = sshll.u32 %s1981_s19, 12 }
  0x34   : > { %s2128_s10 = scalar_select %p49_p11, %s1973_s17, %s51_s6  }
  0x35   : > { %s2134_s14 = scalar_lea.hbm %s2359_s0, %s1495_s11  ;;  %s217_s21 = scalar_lea.vmem [#allocation3], %s1427_s9 }
  0x36   : > { %s227_s22 = sshll.u32 %s217_s21, 4  ;;  %p2140_p13 = pnand %p1656_p12, %p2113_p6  ;;  %s2136_s22 = int_to_ptr.vmem [resolvable:$true] %s227_s22 }
  0x37   : > { %s2144_s6 = scalar_lea.sflag [#allocation4], %s213_s29  ;;  %s1813_s30 = scalar_lea.hbm %s2134_s14, 4096 }
  0x38   : > { %p1814_p0 = scmp.ne.s32.totalorder %s2134_s14, %s1813_s30  ;;  %p1815_p3 = pneg %p2140_p13 }
  0x39   : > { %s1818_s7 = scalar_lea.hbm %s2359_s0, 8192  ;;  %p1819_p9 = scmp.lt.u32.totalorder %s2134_s14, %s2359_s0 }
  0x3a   : > { %p1816_p5 = pnand %p1815_p3, %p1814_p0  ;;  %p1820_p1 = scmp.lt.u32.totalorder %s1818_s7, %s1813_s30 }
  0x3b   : > { %p1822_p4 = scmp.lt.u32.totalorder %s1813_s30, %s2134_s14 }
  0x3c   : > { %p1817_p7 = pneg %p1816_p5  ;;  %p1821_p2 = por %p1820_p1, %p1819_p9 }
  0x3e   : > { %p1823_p6 = por %p1822_p4, %p1821_p2 }
  0x40   : > { %p1824_p8 = pnand %p1823_p6, %p1817_p7 }
  0x42   : > { %1827 = shalt.err (!%p1824_p8)
}
  0x43   : > { %s1828_s29 = scalar_lea.vmem %s2136_s22, 4096  ;;  %s1990_s21 = smov [#allocation3]  }
  0x44   : > { %p1829_p12 = scmp.ne.s32.totalorder %s2136_s22, %s1828_s29  ;;  %s1833_s9 = sshll.u32 %s1990_s21, 4  ;;  %s1834_s9 = int_to_ptr.vmem [resolvable:$false] %s1833_s9 }
  0x45   : > { %s1835_s11 = scalar_lea.vmem %s1834_s9, 8192  ;;  %p1836_p5 = scmp.lt.s32.totalorder %s2136_s22, %s1834_s9 }
  0x46   : > { %p1831_p11 = pnand %p1829_p12, %p1815_p3  ;;  %p1837_p9 = scmp.lt.s32.totalorder %s1835_s11, %s1828_s29 }
  0x48   : > { %p1832_p0 = pneg %p1831_p11  ;;  %p1838_p1 = por %p1837_p9, %p1836_p5 }
  0x4a   : > { %p1839_p2 = pnand %p1838_p1, %p1832_p0 }
  0x4c   : > { %1842 = shalt.err (!%p1839_p2)
}
  0x4d   : > { %s1991_s30 = smov 128   ;;  %s1992_s7 = smov 8  }
  0x4e   : > { %1650 = dma.hbm_to_vmem [thread:$0]  (!%p2140_p13), %s2134_s14, 4096, %s2136_s22, %s2144_s6, %s1991_s30, %s1991_s30, %s1992_s7  }
  0x4f   : > { %p2379_p3 = scmp.ne.s32.totalorder %s2373_s27, 0 }
  0x50   : > { %s2175_s12 = sand.u32 (!%p2379_p3), 1, %s1969_s16   ;;  %p2380_p7 = scmp.ne.s32.totalorder (!%p2379_p3), %s2371_s25, 0 }
  0x51   : > { %239 = sbr.rel (%p2379_p3) target bundleno = 609 (0x261), region = 28  ;;  %s1432_s13 = sshll.u32 (!%p2379_p3), %s2175_s12, 8 }
  0x52   : > { %s242_s29 = scalar_lea.sflag (!%p2379_p3), [#allocation4], %s2175_s12  ;;  %s2181_s21 = scalar_lea.vmem (!%p2379_p3), [#allocation3], %s1432_s13 }
  0x58   : > { %1948 = dma.done.wait (%p2380_p7), %s242_s29, 4096  }
  0x59   : > { %1950 = vsyncadd (%p2380_p7), %s242_s29, 4294963200  ;;  %p2381_p13 = scmp.ne.s32.totalorder %s2369_s23, 0 }
  0x5b   : > { %1952 = dma.done.wait (%p2381_p13), [#allocation7], 2048  }
  0x5c   : > { %1954 = vsyncadd (%p2381_p13), [#allocation7], 4294965248  ;;  %v1721_v0 = vld [vmem:[#allocation6 + $0x40] sm:$0xff]   ;;  %v1723_v2 = vld [vmem:[#allocation6 + $0x48] sm:$0xff]   ;;  %p959_p4 = scmp.eq.s32.totalorder %s1977_s18, 0  ;;  %s2226_s23 = scalar_lea.vmem [#allocation8], %s1432_s13 }
  0x5d   : > { %v1722_v1 = vld [vmem:[#allocation6] sm:$0xff]   ;;  %1499 = vmatprep.subr.bf16.mxu0 %v1721_v0  ;;  %1611 = vmatprep.subr.bf16.mxu1 %v1721_v0  ;;  %v1724_v3 = vld [vmem:[#allocation6 + $0x8] sm:$0xff]   ;;  %v1725_v4 = vld [vmem:[#allocation6 + $0x50] sm:$0xff]  }
  0x5e   : > { %1500 = vmatpush3.bf16.msra.mxu0 %v1722_v1  ;;  %1619 = vmatpush3.bf16.msra.mxu1 %v1722_v1  ;;  %v1726_v5 = vld [vmem:[#allocation6 + $0x10] sm:$0xff]   ;;  %v1727_v6 = vld [vmem:[#allocation6 + $0x58] sm:$0xff]   ;;  %v1729_v8 = vld [vmem:[#allocation6 + $0x60] sm:$0xff]  }
  0x5f   : > { %1501 = vmatprep.subr.bf16.mxu0 %v1723_v2  ;;  %1612 = vmatprep.subr.bf16.mxu1 %v1723_v2  ;;  %v1728_v7 = vld [vmem:[#allocation6 + $0x18] sm:$0xff]   ;;  %v1730_v9 = vld [vmem:[#allocation6 + $0x20] sm:$0xff]   ;;  %v1731_v10 = vld [vmem:[#allocation6 + $0x68] sm:$0xff]  }
  0x60   : > { %v1739_v11 = vld [vmem:[%s2181_s21 + $0x4] ss:$8 sps:$4 sm:$0xff]   ;;  %v1733_v14 = vld [vmem:[#allocation6 + $0x70] sm:$0xff]   ;;  %v1735_v16 = vld [vmem:[#allocation6 + $0x78] sm:$0xff]  }
  0x61   : > { %v1742_v12 = vld [vmem:[%s2181_s21 + $0x84] ss:$8 sps:$4 sm:$0xff]   ;;  %699 = vmatprep.mubr.bf16.mxu0 %v1739_v11  ;;  %v1734_v15 = vld [vmem:[#allocation6 + $0x30] sm:$0xff]   ;;  %v1736_v17 = vld [vmem:[#allocation6 + $0x38] sm:$0xff]  }
  0x62   : > { %1502 = vmatpush3.bf16.msra.mxu0 %v1724_v3  ;;  %1620 = vmatpush3.bf16.msra.mxu1 %v1724_v3  ;;  %v1732_v13 = vld [vmem:[#allocation6 + $0x28] sm:$0xff]   ;;  %v1743_v20 = vld [vmem:[%s2181_s21 + $0x14] ss:$8 sps:$4 sm:$0xff]   ;;  %v1747_v22 = vld [vmem:[%s2181_s21 + $0x10] ss:$8 sps:$4 sm:$0xff]  }
  0x63   : > { %1503 = vmatprep.subr.bf16.mxu0 %v1725_v4  ;;  %1613 = vmatprep.subr.bf16.mxu1 %v1725_v4  ;;  %v1737_v18 = vld [vmem:[%s2181_s21] ss:$8 sps:$4 sm:$0xff]   ;;  %v1745_v21 = vld [vmem:[%s2181_s21 + $0x94] ss:$8 sps:$4 sm:$0xff]   ;;  %v1748_v23 = vld [vmem:[%s2181_s21 + $0x90] ss:$8 sps:$4 sm:$0xff]  }
  0x64   : > { %763 = vmatprep.mubr.bf16.mxu1 %v1742_v12  ;;  %v1740_v19 = vld [vmem:[%s2181_s21 + $0x80] ss:$8 sps:$4 sm:$0xff]   ;;  %v1749_v24 = vld [vmem:[%s2181_s21 + $0x24] ss:$8 sps:$4 sm:$0xff]   ;;  %v1755_v28 = vld [vmem:[%s2181_s21 + $0x34] ss:$8 sps:$4 sm:$0xff]  }
  0x65   : > { %v1751_v25 = vld [vmem:[%s2181_s21 + $0xa4] ss:$8 sps:$4 sm:$0xff]   ;;  %v1753_v26 = vld [vmem:[%s2181_s21 + $0x20] ss:$8 sps:$4 sm:$0xff]   ;;  %v1757_v29 = vld [vmem:[%s2181_s21 + $0xb4] ss:$8 sps:$4 sm:$0xff]  }
  0x66   : > { %1504 = vmatpush3.bf16.msra.mxu0 %v1726_v5  ;;  %1621 = vmatpush3.bf16.msra.mxu1 %v1726_v5  ;;  %v1754_v27 = vld [vmem:[%s2181_s21 + $0xa0] ss:$8 sps:$4 sm:$0xff]   ;;  %v1759_v30 = vld [vmem:[%s2181_s21 + $0x30] ss:$8 sps:$4 sm:$0xff]   ;;  %v1761_v32 = vld [vmem:[%s2181_s21 + $0x44] ss:$8 sps:$4 sm:$0xff]  }
  0x67   : > { %1505 = vmatprep.subr.bf16.mxu0 %v1727_v6  ;;  %1614 = vmatprep.subr.bf16.mxu1 %v1727_v6  ;;  %v1760_v31 = vld [vmem:[%s2181_s21 + $0xb0] ss:$8 sps:$4 sm:$0xff]   ;;  %v1763_v33 = vld [vmem:[%s2181_s21 + $0xc4] ss:$8 sps:$4 sm:$0xff]   ;;  %v1765_v34 = vld [vmem:[%s2181_s21 + $0x40] ss:$8 sps:$4 sm:$0xff]  }
  0x68   : > { %v1766_v35 = vld [vmem:[%s2181_s21 + $0xc0] ss:$8 sps:$4 sm:$0xff]   ;;  %v1767_v36 = vld [vmem:[%s2181_s21 + $0x54] ss:$8 sps:$4 sm:$0xff]   ;;  %v1771_v38 = vld [vmem:[%s2181_s21 + $0x50] ss:$8 sps:$4 sm:$0xff]  }
  0x69   : > { %v1769_v37 = vld [vmem:[%s2181_s21 + $0xd4] ss:$8 sps:$4 sm:$0xff]   ;;  %v1772_v39 = vld [vmem:[%s2181_s21 + $0xd0] ss:$8 sps:$4 sm:$0xff]   ;;  %v1773_v40 = vld [vmem:[%s2181_s21 + $0x64] ss:$8 sps:$4 sm:$0xff]  }
  0x6a   : > { %1506 = vmatpush3.bf16.msra.mxu0 %v1728_v7  ;;  %1622 = vmatpush3.bf16.msra.mxu1 %v1728_v7  ;;  %v1775_v41 = vld [vmem:[%s2181_s21 + $0xe4] ss:$8 sps:$4 sm:$0xff]   ;;  %v1777_v42 = vld [vmem:[%s2181_s21 + $0x60] ss:$8 sps:$4 sm:$0xff]   ;;  %v1779_v44 = vld [vmem:[%s2181_s21 + $0x74] ss:$8 sps:$4 sm:$0xff]  }
  0x6b   : > { %1507 = vmatprep.subr.bf16.mxu0 %v1729_v8  ;;  %1615 = vmatprep.subr.bf16.mxu1 %v1729_v8  ;;  %v1778_v43 = vld [vmem:[%s2181_s21 + $0xe0] ss:$8 sps:$4 sm:$0xff]   ;;  %v1781_v45 = vld [vmem:[%s2181_s21 + $0xf4] ss:$8 sps:$4 sm:$0xff]   ;;  %v1783_v46 = vld [vmem:[%s2181_s21 + $0x70] ss:$8 sps:$4 sm:$0xff]  }
  0x6c   : > { %v1784_v47 = vld [vmem:[%s2181_s21 + $0xf0] ss:$8 sps:$4 sm:$0xff]  }
  0x6e   : > { %1508 = vmatpush3.bf16.msra.mxu0 %v1730_v9  ;;  %1623 = vmatpush3.bf16.msra.mxu1 %v1730_v9 }
  0x6f   : > { %1509 = vmatprep.subr.bf16.mxu0 %v1731_v10  ;;  %1616 = vmatprep.subr.bf16.mxu1 %v1731_v10 }
  0x72   : > { %1510 = vmatpush3.bf16.msra.mxu0 %v1732_v13  ;;  %1624 = vmatpush3.bf16.msra.mxu1 %v1732_v13 }
  0x73   : > { %1511 = vmatprep.subr.bf16.mxu0 %v1733_v14  ;;  %1617 = vmatprep.subr.bf16.mxu1 %v1733_v14 }
  0x76   : > { %1512 = vmatpush3.bf16.msra.mxu0 %v1734_v15  ;;  %1625 = vmatpush3.bf16.msra.mxu1 %v1734_v15 }
  0x77   : > { %1513 = vmatprep.subr.bf16.mxu0 %v1735_v16  ;;  %1618 = vmatprep.subr.bf16.mxu1 %v1735_v16 }
  0x7a   : > { %1514 = vmatpush3.bf16.msra.mxu0 %v1736_v17  ;;  %1626 = vmatpush3.bf16.msra.mxu1 %v1736_v17 }
  0x7d   : > { %700 = vmatmul.mubr.bf16.vlgmr.msra.gmra.mrb[0].mxu0 %v1737_v18  ;;  %764 = vmatmul.mubr.bf16.vlgmr.msra.gmra.mrb[0].mxu1 %v1740_v19 }
  0x7e   : > { %707 = vmatprep.mubr.bf16.mxu0 %v1743_v20  ;;  %771 = vmatprep.mubr.bf16.mxu1 %v1745_v21 }
  0x85   : > { %708 = vmatmul.mubr.bf16.gmra.mrb[4].mxu0 %v1747_v22  ;;  %772 = vmatmul.mubr.bf16.gmra.mrb[4].mxu1 %v1748_v23 }
  0x86   : > { %715 = vmatprep.mubr.bf16.mxu0 %v1749_v24  ;;  %779 = vmatprep.mubr.bf16.mxu1 %v1751_v25 }
  0x8d   : > { %716 = vmatmul.mubr.bf16.gmra.mrb[8].mxu0 %v1753_v26  ;;  %780 = vmatmul.mubr.bf16.gmra.mrb[8].mxu1 %v1754_v27 }
  0x8e   : > { %723 = vmatprep.mubr.bf16.mxu0 %v1755_v28  ;;  %787 = vmatprep.mubr.bf16.mxu1 %v1757_v29 }
  0x95   : > { %724 = vmatmul.mubr.bf16.gmra.mrb[12].mxu0 %v1759_v30  ;;  %788 = vmatmul.mubr.bf16.gmra.mrb[12].mxu1 %v1760_v31 }
  0x96   : > { %731 = vmatprep.mubr.bf16.mxu0 %v1761_v32  ;;  %795 = vmatprep.mubr.bf16.mxu1 %v1763_v33 }
  0x9d   : > { %732 = vmatmul.mubr.bf16.gmra.mrb[16].mxu0 %v1765_v34  ;;  %796 = vmatmul.mubr.bf16.gmra.mrb[16].mxu1 %v1766_v35 }
  0x9e   : > { %739 = vmatprep.mubr.bf16.mxu0 %v1767_v36  ;;  %803 = vmatprep.mubr.bf16.mxu1 %v1769_v37 }
  0xa5   : > { %740 = vmatmul.mubr.bf16.gmra.mrb[20].mxu0 %v1771_v38  ;;  %804 = vmatmul.mubr.bf16.gmra.mrb[20].mxu1 %v1772_v39 }
  0xa6   : > { %747 = vmatprep.mubr.bf16.mxu0 %v1773_v40  ;;  %811 = vmatprep.mubr.bf16.mxu1 %v1775_v41 }
  0xad   : > { %748 = vmatmul.mubr.bf16.gmra.mrb[24].mxu0 %v1777_v42  ;;  %812 = vmatmul.mubr.bf16.gmra.mrb[24].mxu1 %v1778_v43 }
  0xae   : > { %755 = vmatprep.mubr.bf16.mxu0 %v1779_v44  ;;  %819 = vmatprep.mubr.bf16.mxu1 %v1781_v45 }
  0xb5   : > { %756 = vmatmul.mubr.bf16.gmra.mrb[28].mxu0 %v1783_v46  ;;  %820 = vmatmul.mubr.bf16.gmra.mrb[28].mxu1 %v1784_v47 }
 0x150   : > { %v1515_v48 = vpop.f32.mrb[0].mxu0  ;;  %v1563_v49 = vpop.f32.mrb[0].mxu1 }
 0x151   : > { %v1516_v50 = vpop.f32.mrb[1].mxu0  ;;  %v1564_v51 = vpop.f32.mrb[1].mxu1 }
 0x152   : > { %v1517_v52 = vadd.f32 %v1516_v50, %v1515_v48  ;;  %v1565_v53 = vadd.f32 %v1564_v51, %v1563_v49  ;;  %v1518_v54 = vpop.f32.mrb[2].mxu0  ;;  %v1566_v55 = vpop.f32.mrb[2].mxu1 }
 0x153   : > { %v1519_v56 = vpop.f32.mrb[3].mxu0  ;;  %v1567_v57 = vpop.f32.mrb[3].mxu1 }
 0x154   : > { %v1520_v58 = vadd.f32 %v1519_v56, %v1518_v54  ;;  %v1568_v59 = vadd.f32 %v1567_v57, %v1566_v55  ;;  %860 = vst [vmem:[#allocation2] sm:$0xff] %v1517_v52  ;;  %927 = vst [vmem:[%s2226_s23] sm:$0xff] %v1517_v52 }
 0x155   : > { %876 = vst [vmem:[#allocation2 + $0x80] sm:$0xff] %v1565_v53  ;;  %943 = vst [vmem:[%s2226_s23 + $0x80] sm:$0xff] %v1565_v53 }
 0x156   : > { %861 = vst [vmem:[#allocation2 + $0x8] sm:$0xff] %v1520_v58  ;;  %928 = vst [vmem:[%s2226_s23 + $0x8] sm:$0xff] %v1520_v58 }
 0x157   : > { %877 = vst [vmem:[#allocation2 + $0x88] sm:$0xff] %v1568_v59  ;;  %944 = vst [vmem:[%s2226_s23 + $0x88] sm:$0xff] %v1568_v59 }
 0x158   : > { %v1521_v60 = vpop.f32.mrb[4].mxu0  ;;  %v1569_v61 = vpop.f32.mrb[4].mxu1 }
 0x159   : > { %v1522_v62 = vpop.f32.mrb[5].mxu0  ;;  %v1570_v63 = vpop.f32.mrb[5].mxu1 }
 0x15a   : > { %v1523_v0 = vadd.f32 %v1522_v62, %v1521_v60  ;;  %v1571_v1 = vadd.f32 %v1570_v63, %v1569_v61  ;;  %v1524_v2 = vpop.f32.mrb[6].mxu0  ;;  %v1572_v3 = vpop.f32.mrb[6].mxu1 }
 0x15b   : > { %v1525_v4 = vpop.f32.mrb[7].mxu0  ;;  %v1573_v5 = vpop.f32.mrb[7].mxu1 }
 0x15c   : > { %v1526_v6 = vadd.f32 %v1525_v4, %v1524_v2  ;;  %v1574_v7 = vadd.f32 %v1573_v5, %v1572_v3  ;;  %862 = vst [vmem:[#allocation2 + $0x10] sm:$0xff] %v1523_v0  ;;  %929 = vst [vmem:[%s2226_s23 + $0x10] sm:$0xff] %v1523_v0 }
 0x15d   : > { %878 = vst [vmem:[#allocation2 + $0x90] sm:$0xff] %v1571_v1  ;;  %945 = vst [vmem:[%s2226_s23 + $0x90] sm:$0xff] %v1571_v1 }
 0x15e   : > { %863 = vst [vmem:[#allocation2 + $0x18] sm:$0xff] %v1526_v6  ;;  %930 = vst [vmem:[%s2226_s23 + $0x18] sm:$0xff] %v1526_v6 }
 0x15f   : > { %879 = vst [vmem:[#allocation2 + $0x98] sm:$0xff] %v1574_v7  ;;  %946 = vst [vmem:[%s2226_s23 + $0x98] sm:$0xff] %v1574_v7 }
 0x160   : > { %v1527_v8 = vpop.f32.mrb[8].mxu0  ;;  %v1575_v9 = vpop.f32.mrb[8].mxu1 }
 0x161   : > { %v1528_v10 = vpop.f32.mrb[9].mxu0  ;;  %v1576_v11 = vpop.f32.mrb[9].mxu1 }
 0x162   : > { %v1529_v12 = vadd.f32 %v1528_v10, %v1527_v8  ;;  %v1577_v13 = vadd.f32 %v1576_v11, %v1575_v9  ;;  %v1530_v14 = vpop.f32.mrb[10].mxu0  ;;  %v1578_v15 = vpop.f32.mrb[10].mxu1 }
 0x163   : > { %v1531_v16 = vpop.f32.mrb[11].mxu0  ;;  %v1579_v17 = vpop.f32.mrb[11].mxu1 }
 0x164   : > { %v1532_v18 = vadd.f32 %v1531_v16, %v1530_v14  ;;  %v1580_v19 = vadd.f32 %v1579_v17, %v1578_v15  ;;  %864 = vst [vmem:[#allocation2 + $0x20] sm:$0xff] %v1529_v12  ;;  %931 = vst [vmem:[%s2226_s23 + $0x20] sm:$0xff] %v1529_v12  ;;  %v964_v16 = vld [vmem:[#allocation2] sm:$0xff] (%p959_p4)  ;;  %v965_v17 = vld [vmem:[#allocation2 + $0x8] sm:$0xff] (%p959_p4) }
 0x165   : > { %880 = vst [vmem:[#allocation2 + $0xa0] sm:$0xff] %v1577_v13  ;;  %947 = vst [vmem:[%s2226_s23 + $0xa0] sm:$0xff] %v1577_v13 }
 0x166   : > { %865 = vst [vmem:[#allocation2 + $0x28] sm:$0xff] %v1532_v18  ;;  %932 = vst [vmem:[%s2226_s23 + $0x28] sm:$0xff] %v1532_v18  ;;  %v966_v18 = vld [vmem:[#allocation2 + $0x10] sm:$0xff] (%p959_p4) }
 0x167   : > { %881 = vst [vmem:[#allocation2 + $0xa8] sm:$0xff] %v1580_v19  ;;  %948 = vst [vmem:[%s2226_s23 + $0xa8] sm:$0xff] %v1580_v19  ;;  %v967_v19 = vld [vmem:[#allocation2 + $0x18] sm:$0xff] (%p959_p4) }
 0x168   : > { %v1533_v20 = vpop.f32.mrb[12].mxu0  ;;  %v1581_v21 = vpop.f32.mrb[12].mxu1 }
 0x169   : > { %v1534_v22 = vpop.f32.mrb[13].mxu0  ;;  %v1582_v23 = vpop.f32.mrb[13].mxu1 }
 0x16a   : > { %v1535_v24 = vadd.f32 %v1534_v22, %v1533_v20  ;;  %v1583_v25 = vadd.f32 %v1582_v23, %v1581_v21  ;;  %v1536_v26 = vpop.f32.mrb[14].mxu0  ;;  %v1584_v27 = vpop.f32.mrb[14].mxu1  ;;  %v996_v20 = vadd.f32 (%p959_p4), %v965_v17, %v964_v16  ;;  %v1034_v21 = vmul.f32 (%p959_p4), %v964_v16, %v964_v16  ;;  %v982_v16 = vld [vmem:[#allocation2 + $0x90] sm:$0xff] (%p959_p4) }
 0x16b   : > { %v1537_v28 = vpop.f32.mrb[15].mxu0  ;;  %v1585_v29 = vpop.f32.mrb[15].mxu1  ;;  %v1035_v22 = vmul.f32 (%p959_p4), %v965_v17, %v965_v17  ;;  %v1036_v23 = vmul.f32 (%p959_p4), %v966_v18, %v966_v18 }
 0x16c   : > { %v1538_v30 = vadd.f32 %v1537_v28, %v1536_v26  ;;  %v1586_v31 = vadd.f32 %v1585_v29, %v1584_v27  ;;  %866 = vst [vmem:[#allocation2 + $0x30] sm:$0xff] %v1535_v24  ;;  %933 = vst [vmem:[%s2226_s23 + $0x30] sm:$0xff] %v1535_v24  ;;  %v968_v24 = vld [vmem:[#allocation2 + $0x20] sm:$0xff] (%p959_p4)  ;;  %v1037_v26 = vmul.f32 (%p959_p4), %v967_v19, %v967_v19 }
 0x16d   : > { %882 = vst [vmem:[#allocation2 + $0xb0] sm:$0xff] %v1583_v25  ;;  %949 = vst [vmem:[%s2226_s23 + $0xb0] sm:$0xff] %v1583_v25  ;;  %v997_v25 = vadd.f32 (%p959_p4), %v996_v20, %v966_v18  ;;  %v1066_v27 = vadd.f32 (%p959_p4), %v1035_v22, %v1034_v21  ;;  %v969_v28 = vld [vmem:[#allocation2 + $0x28] sm:$0xff] (%p959_p4)  ;;  %v983_v20 = vld [vmem:[#allocation2 + $0x98] sm:$0xff] (%p959_p4)  ;;  %v1052_v22 = vmul.f32 (%p959_p4), %v982_v16, %v982_v16 }
 0x16e   : > { %867 = vst [vmem:[#allocation2 + $0x38] sm:$0xff] %v1538_v30  ;;  %934 = vst [vmem:[%s2226_s23 + $0x38] sm:$0xff] %v1538_v30  ;;  %v1038_v30 = vmul.f32 (%p959_p4), %v968_v24, %v968_v24 }
 0x16f   : > { %883 = vst [vmem:[#allocation2 + $0xb8] sm:$0xff] %v1586_v31  ;;  %950 = vst [vmem:[%s2226_s23 + $0xb8] sm:$0xff] %v1586_v31  ;;  %v998_v29 = vadd.f32 (%p959_p4), %v997_v25, %v967_v19  ;;  %v1067_v31 = vadd.f32 (%p959_p4), %v1066_v27, %v1036_v23 }
 0x170   : > { %v1539_v32 = vpop.f32.mrb[16].mxu0  ;;  %v1587_v33 = vpop.f32.mrb[16].mxu1 }
 0x171   : > { %v1540_v34 = vpop.f32.mrb[17].mxu0  ;;  %v1588_v35 = vpop.f32.mrb[17].mxu1 }
 0x172   : > { %v1541_v36 = vadd.f32 %v1540_v34, %v1539_v32  ;;  %v1589_v37 = vadd.f32 %v1588_v35, %v1587_v33  ;;  %v1542_v38 = vpop.f32.mrb[18].mxu0  ;;  %v1590_v39 = vpop.f32.mrb[18].mxu1  ;;  %v999_v33 = vadd.f32 (%p959_p4), %v998_v29, %v968_v24  ;;  %v1039_v34 = vmul.f32 (%p959_p4), %v969_v28, %v969_v28  ;;  %v984_v24 = vld [vmem:[#allocation2 + $0xa0] sm:$0xff] (%p959_p4) }
 0x173   : > { %v1543_v40 = vpop.f32.mrb[19].mxu0  ;;  %v1591_v41 = vpop.f32.mrb[19].mxu1  ;;  %v970_v32 = vld [vmem:[#allocation2 + $0x30] sm:$0xff] (%p959_p4)  ;;  %v1068_v35 = vadd.f32 (%p959_p4), %v1067_v31, %v1037_v26  ;;  %v1053_v26 = vmul.f32 (%p959_p4), %v983_v20, %v983_v20 }
 0x174   : > { %v1544_v42 = vadd.f32 %v1543_v40, %v1542_v38  ;;  %v1592_v43 = vadd.f32 %v1591_v41, %v1590_v39  ;;  %868 = vst [vmem:[#allocation2 + $0x40] sm:$0xff] %v1541_v36  ;;  %935 = vst [vmem:[%s2226_s23 + $0x40] sm:$0xff] %v1541_v36  ;;  %v1040_v38 = vmul.f32 (%p959_p4), %v970_v32, %v970_v32 }
 0x175   : > { %884 = vst [vmem:[#allocation2 + $0xc0] sm:$0xff] %v1589_v37  ;;  %951 = vst [vmem:[%s2226_s23 + $0xc0] sm:$0xff] %v1589_v37  ;;  %v971_v36 = vld [vmem:[#allocation2 + $0x38] sm:$0xff] (%p959_p4)  ;;  %v1000_v37 = vadd.f32 (%p959_p4), %v999_v33, %v969_v28  ;;  %v1069_v39 = vadd.f32 (%p959_p4), %v1068_v35, %v1038_v30  ;;  %v985_v28 = vld [vmem:[#allocation2 + $0xa8] sm:$0xff] (%p959_p4)  ;;  %v1054_v30 = vmul.f32 (%p959_p4), %v984_v24, %v984_v24 }
 0x176   : > { %869 = vst [vmem:[#allocation2 + $0x48] sm:$0xff] %v1544_v42  ;;  %936 = vst [vmem:[%s2226_s23 + $0x48] sm:$0xff] %v1544_v42  ;;  %v1041_v42 = vmul.f32 (%p959_p4), %v971_v36, %v971_v36 }
 0x177   : > { %885 = vst [vmem:[#allocation2 + $0xc8] sm:$0xff] %v1592_v43  ;;  %952 = vst [vmem:[%s2226_s23 + $0xc8] sm:$0xff] %v1592_v43  ;;  %v1001_v41 = vadd.f32 (%p959_p4), %v1000_v37, %v970_v32  ;;  %v1070_v43 = vadd.f32 (%p959_p4), %v1069_v39, %v1039_v34  ;;  %v986_v32 = vld [vmem:[#allocation2 + $0xb0] sm:$0xff] (%p959_p4)  ;;  %v1055_v34 = vmul.f32 (%p959_p4), %v985_v28, %v985_v28 }
 0x178   : > { %v1545_v44 = vpop.f32.mrb[20].mxu0  ;;  %v1593_v45 = vpop.f32.mrb[20].mxu1 }
 0x179   : > { %v1546_v46 = vpop.f32.mrb[21].mxu0  ;;  %v1594_v47 = vpop.f32.mrb[21].mxu1 }
 0x17a   : > { %v1547_v48 = vadd.f32 %v1546_v46, %v1545_v44  ;;  %v1595_v49 = vadd.f32 %v1594_v47, %v1593_v45  ;;  %v1548_v50 = vpop.f32.mrb[22].mxu0  ;;  %v1596_v51 = vpop.f32.mrb[22].mxu1  ;;  %v1002_v45 = vadd.f32 (%p959_p4), %v1001_v41, %v971_v36  ;;  %v1071_v47 = vadd.f32 (%p959_p4), %v1070_v43, %v1040_v38  ;;  %v987_v36 = vld [vmem:[#allocation2 + $0xb8] sm:$0xff] (%p959_p4) }
 0x17b   : > { %v1549_v52 = vpop.f32.mrb[23].mxu0  ;;  %v1597_v53 = vpop.f32.mrb[23].mxu1  ;;  %v972_v40 = vld [vmem:[#allocation2 + $0x40] sm:$0xff] (%p959_p4)  ;;  %v1056_v38 = vmul.f32 (%p959_p4), %v986_v32, %v986_v32 }
 0x17c   : > { %v1550_v54 = vadd.f32 %v1549_v52, %v1548_v50  ;;  %v1598_v55 = vadd.f32 %v1597_v53, %v1596_v51  ;;  %870 = vst [vmem:[#allocation2 + $0x50] sm:$0xff] %v1547_v48  ;;  %937 = vst [vmem:[%s2226_s23 + $0x50] sm:$0xff] %v1547_v48  ;;  %v1042_v46 = vmul.f32 (%p959_p4), %v972_v40, %v972_v40 }
 0x17d   : > { %886 = vst [vmem:[#allocation2 + $0xd0] sm:$0xff] %v1595_v49  ;;  %953 = vst [vmem:[%s2226_s23 + $0xd0] sm:$0xff] %v1595_v49  ;;  %v973_v44 = vld [vmem:[#allocation2 + $0x48] sm:$0xff] (%p959_p4)  ;;  %v1003_v49 = vadd.f32 (%p959_p4), %v1002_v45, %v972_v40  ;;  %v1072_v51 = vadd.f32 (%p959_p4), %v1071_v47, %v1041_v42  ;;  %v988_v40 = vld [vmem:[#allocation2 + $0xc0] sm:$0xff] (%p959_p4)  ;;  %v1057_v42 = vmul.f32 (%p959_p4), %v987_v36, %v987_v36 }
 0x17e   : > { %871 = vst [vmem:[#allocation2 + $0x58] sm:$0xff] %v1550_v54  ;;  %938 = vst [vmem:[%s2226_s23 + $0x58] sm:$0xff] %v1550_v54  ;;  %v1043_v50 = vmul.f32 (%p959_p4), %v973_v44, %v973_v44 }
 0x17f   : > { %887 = vst [vmem:[#allocation2 + $0xd8] sm:$0xff] %v1598_v55  ;;  %954 = vst [vmem:[%s2226_s23 + $0xd8] sm:$0xff] %v1598_v55  ;;  %v1004_v53 = vadd.f32 (%p959_p4), %v1003_v49, %v973_v44  ;;  %v1073_v55 = vadd.f32 (%p959_p4), %v1072_v51, %v1042_v46  ;;  %v989_v44 = vld [vmem:[#allocation2 + $0xc8] sm:$0xff] (%p959_p4)  ;;  %v1058_v46 = vmul.f32 (%p959_p4), %v988_v40, %v988_v40 }
 0x180   : > { %v1551_v56 = vpop.f32.mrb[24].mxu0  ;;  %v1599_v57 = vpop.f32.mrb[24].mxu1 }
 0x181   : > { %v1552_v58 = vpop.f32.mrb[25].mxu0  ;;  %v1600_v59 = vpop.f32.mrb[25].mxu1 }
 0x182   : > { %v1553_v60 = vadd.f32 %v1552_v58, %v1551_v56  ;;  %v1601_v61 = vadd.f32 %v1600_v59, %v1599_v57  ;;  %v1554_v62 = vpop.f32.mrb[26].mxu0  ;;  %v1602_v63 = vpop.f32.mrb[26].mxu1  ;;  %v1074_v59 = vadd.f32 (%p959_p4), %v1073_v55, %v1043_v50  ;;  %v1059_v50 = vmul.f32 (%p959_p4), %v989_v44, %v989_v44 }
 0x183   : > { %v1555_v0 = vpop.f32.mrb[27].mxu0  ;;  %v1603_v1 = vpop.f32.mrb[27].mxu1  ;;  %v974_v48 = vld [vmem:[#allocation2 + $0x50] sm:$0xff] (%p959_p4) }
 0x184   : > { %v1556_v2 = vadd.f32 %v1555_v0, %v1554_v62  ;;  %v1604_v3 = vadd.f32 %v1603_v1, %v1602_v63  ;;  %872 = vst [vmem:[#allocation2 + $0x60] sm:$0xff] %v1553_v60  ;;  %939 = vst [vmem:[%s2226_s23 + $0x60] sm:$0xff] %v1553_v60  ;;  %v1044_v54 = vmul.f32 (%p959_p4), %v974_v48, %v974_v48 }
 0x185   : > { %888 = vst [vmem:[#allocation2 + $0xe0] sm:$0xff] %v1601_v61  ;;  %955 = vst [vmem:[%s2226_s23 + $0xe0] sm:$0xff] %v1601_v61  ;;  %v975_v52 = vld [vmem:[#allocation2 + $0x58] sm:$0xff] (%p959_p4)  ;;  %v1005_v57 = vadd.f32 (%p959_p4), %v1004_v53, %v974_v48  ;;  %v990_v48 = vld [vmem:[#allocation2 + $0xd0] sm:$0xff] (%p959_p4) }
 0x186   : > { %873 = vst [vmem:[#allocation2 + $0x68] sm:$0xff] %v1556_v2  ;;  %940 = vst [vmem:[%s2226_s23 + $0x68] sm:$0xff] %v1556_v2  ;;  %v1045_v58 = vmul.f32 (%p959_p4), %v975_v52, %v975_v52  ;;  %v1075_v63 = vadd.f32 (%p959_p4), %v1074_v59, %v1044_v54  ;;  %v1060_v54 = vmul.f32 (%p959_p4), %v990_v48, %v990_v48 }
 0x187   : > { %889 = vst [vmem:[#allocation2 + $0xe8] sm:$0xff] %v1604_v3  ;;  %956 = vst [vmem:[%s2226_s23 + $0xe8] sm:$0xff] %v1604_v3  ;;  %v1006_v61 = vadd.f32 (%p959_p4), %v1005_v57, %v975_v52  ;;  %v991_v52 = vld [vmem:[#allocation2 + $0xd8] sm:$0xff] (%p959_p4) }
 0x188   : > { %v1557_v4 = vpop.f32.mrb[28].mxu0  ;;  %v1605_v5 = vpop.f32.mrb[28].mxu1  ;;  %v1076_v3 = vadd.f32 (%p959_p4), %v1075_v63, %v1045_v58  ;;  %v1061_v58 = vmul.f32 (%p959_p4), %v991_v52, %v991_v52 }
 0x189   : > { %v1558_v6 = vpop.f32.mrb[29].mxu0  ;;  %v1606_v7 = vpop.f32.mrb[29].mxu1  ;;  %963 = sbr.rel (!%p959_p4) target bundleno = 455 (0x1c7), region = 48 }
 0x18a   : > { %v1559_v8 = vadd.f32 %v1558_v6, %v1557_v4  ;;  %v1607_v9 = vadd.f32 %v1606_v7, %v1605_v5  ;;  %v1560_v10 = vpop.f32.mrb[30].mxu0  ;;  %v1608_v11 = vpop.f32.mrb[30].mxu1 }
 0x18b   : > { %v1561_v12 = vpop.f32.mrb[31].mxu0  ;;  %v1609_v13 = vpop.f32.mrb[31].mxu1  ;;  %v976_v56 = vld [vmem:[#allocation2 + $0x60] sm:$0xff] (%p959_p4) }
 0x18c   : > { %v1562_v14 = vadd.f32 %v1561_v12, %v1560_v10  ;;  %v1610_v15 = vadd.f32 %v1609_v13, %v1608_v11  ;;  %874 = vst [vmem:[#allocation2 + $0x70] sm:$0xff] %v1559_v8  ;;  %941 = vst [vmem:[%s2226_s23 + $0x70] sm:$0xff] %v1559_v8  ;;  %v1046_v62 = vmul.f32 (%p959_p4), %v976_v56, %v976_v56  ;;  %v980_v8 = vld [vmem:[#allocation2 + $0x80] sm:$0xff] (%p959_p4)  ;;  %v981_v12 = vld [vmem:[#allocation2 + $0x88] sm:$0xff] (%p959_p4) }
 0x18d   : > { %890 = vst [vmem:[#allocation2 + $0xf0] sm:$0xff] %v1607_v9  ;;  %957 = vst [vmem:[%s2226_s23 + $0xf0] sm:$0xff] %v1607_v9  ;;  %v977_v60 = vld [vmem:[#allocation2 + $0x68] sm:$0xff] (%p959_p4)  ;;  %v1007_v1 = vadd.f32 (%p959_p4), %v1006_v61, %v976_v56  ;;  %v1051_v18 = vmul.f32 (%p959_p4), %v981_v12, %v981_v12  ;;  %v992_v56 = vld [vmem:[#allocation2 + $0xe0] sm:$0xff] (%p959_p4) }
 0x18e   : > { %875 = vst [vmem:[#allocation2 + $0x78] sm:$0xff] %v1562_v14  ;;  %942 = vst [vmem:[%s2226_s23 + $0x78] sm:$0xff] %v1562_v14  ;;  %v1047_v2 = vmul.f32 (%p959_p4), %v977_v60, %v977_v60  ;;  %v1077_v7 = vadd.f32 (%p959_p4), %v1076_v3, %v1046_v62  ;;  %v1050_v14 = vmul.f32 (%p959_p4), %v980_v8, %v980_v8 }
 0x18f   : > { %891 = vst [vmem:[#allocation2 + $0xf8] sm:$0xff] %v1610_v15  ;;  %958 = vst [vmem:[%s2226_s23 + $0xf8] sm:$0xff] %v1610_v15  ;;  %v1008_v5 = vadd.f32 (%p959_p4), %v1007_v1, %v977_v60  ;;  %v993_v60 = vld [vmem:[#allocation2 + $0xe8] sm:$0xff] (%p959_p4)  ;;  %v1062_v62 = vmul.f32 (%p959_p4), %v992_v56, %v992_v56 }
 0x190   : > { %v1078_v11 = vadd.f32 %v1077_v7, %v1047_v2  ;;  %v1063_v2 = vmul.f32 %v993_v60, %v993_v60 }
 0x193   : > { %v978_v0 = vld [vmem:[#allocation2 + $0x70] sm:$0xff] }
 0x194   : > { %v1048_v6 = vmul.f32 %v978_v0, %v978_v0  ;;  %v1009_v9 = vadd.f32 %v1008_v5, %v978_v0  ;;  %v994_v0 = vld [vmem:[#allocation2 + $0xf0] sm:$0xff] }
 0x195   : > { %v979_v4 = vld [vmem:[#allocation2 + $0x78] sm:$0xff] }
 0x196   : > { %v1049_v10 = vmul.f32 %v979_v4, %v979_v4  ;;  %v1010_v13 = vadd.f32 %v1009_v9, %v979_v4  ;;  %v1079_v15 = vadd.f32 %v1078_v11, %v1048_v6  ;;  %v995_v4 = vld [vmem:[#allocation2 + $0xf8] sm:$0xff]  ;;  %v1064_v6 = vmul.f32 %v994_v0, %v994_v0 }
 0x197   : > { %v1065_v9 = vmul.f32 %v995_v4, %v995_v4 }
 0x198   : > { %v1011_v17 = vadd.f32 %v1010_v13, %v980_v8  ;;  %v1080_v19 = vadd.f32 %v1079_v15, %v1049_v10 }
 0x19a   : > { %v1012_v21 = vadd.f32 %v1011_v17, %v981_v12  ;;  %v1081_v23 = vadd.f32 %v1080_v19, %v1050_v14 }
 0x19c   : > { %v1013_v25 = vadd.f32 %v1012_v21, %v982_v16  ;;  %v1082_v27 = vadd.f32 %v1081_v23, %v1051_v18 }
 0x19e   : > { %v1014_v29 = vadd.f32 %v1013_v25, %v983_v20  ;;  %v1083_v31 = vadd.f32 %v1082_v27, %v1052_v22 }
 0x1a0   : > { %v1015_v33 = vadd.f32 %v1014_v29, %v984_v24  ;;  %v1084_v35 = vadd.f32 %v1083_v31, %v1053_v26 }
 0x1a2   : > { %v1016_v37 = vadd.f32 %v1015_v33, %v985_v28  ;;  %v1085_v39 = vadd.f32 %v1084_v35, %v1054_v30 }
 0x1a4   : > { %v1017_v41 = vadd.f32 %v1016_v37, %v986_v32  ;;  %v1086_v43 = vadd.f32 %v1085_v39, %v1055_v34 }
 0x1a6   : > { %v1018_v45 = vadd.f32 %v1017_v41, %v987_v36  ;;  %v1087_v47 = vadd.f32 %v1086_v43, %v1056_v38 }
 0x1a8   : > { %v1019_v49 = vadd.f32 %v1018_v45, %v988_v40  ;;  %v1088_v51 = vadd.f32 %v1087_v47, %v1057_v42 }
 0x1aa   : > { %v1020_v53 = vadd.f32 %v1019_v49, %v989_v44  ;;  %v1089_v55 = vadd.f32 %v1088_v51, %v1058_v46 }
 0x1ac   : > { %v1021_v57 = vadd.f32 %v1020_v53, %v990_v48  ;;  %v1090_v59 = vadd.f32 %v1089_v55, %v1059_v50 }
 0x1ae   : > { %v1022_v61 = vadd.f32 %v1021_v57, %v991_v52  ;;  %v1091_v63 = vadd.f32 %v1090_v59, %v1060_v54 }
 0x1b0   : > { %v1023_v1 = vadd.f32 %v1022_v61, %v992_v56  ;;  %v1092_v3 = vadd.f32 %v1091_v63, %v1061_v58 }
 0x1b2   : > { %v1024_v5 = vadd.f32 %v1023_v1, %v993_v60  ;;  %v1093_v7 = vadd.f32 %v1092_v3, %v1062_v62 }
 0x1b4   : > { %v1025_v8 = vadd.f32 %v1024_v5, %v994_v0  ;;  %v1094_v10 = vadd.f32 %v1093_v7, %v1063_v2 }
 0x1b6   : > { %v1026_v11 = vadd.f32 %v1025_v8, %v995_v4  ;;  %v1095_v12 = vadd.f32 %v1094_v10, %v1064_v6 }
 0x1b8   : > { %v1027_v13 = vrot.slane %v1026_v11, 4  ;;  %v1096_v14 = vadd.f32 %v1095_v12, %v1065_v9 }
 0x1ba   : > { %v1028_v15 = vadd.f32 %v1027_v13, %v1026_v11  ;;  %v1097_v16 = vrot.slane %v1096_v14, 4 }
 0x1bc   : > { %v1029_v17 = vrot.slane %v1028_v15, 2  ;;  %v1098_v18 = vadd.f32 %v1097_v16, %v1096_v14 }
 0x1be   : > { %v1030_v19 = vadd.f32 %v1029_v17, %v1028_v15  ;;  %v1099_v20 = vrot.slane %v1098_v18, 2 }
 0x1c0   : > { %v1031_v21 = vrot.slane %v1030_v19, 1  ;;  %v1100_v22 = vadd.f32 %v1099_v20, %v1098_v18 }
 0x1c2   : > { %v1032_v23 = vadd.f32 %v1031_v21, %v1030_v19  ;;  %v1101_v24 = vrot.slane %v1100_v22, 1 }
 0x1c4   : > { %1033 = vst [vmem:[#allocation9] sm:$0x1] %v1032_v23  ;;  %v1102_v25 = vadd.f32 %v1101_v24, %v1100_v22 }
 0x1c6   : > { %1103 = vst [vmem:[#allocation11] sm:$0x1] %v1102_v25 }
 0x1c7 PF: > { %p1104_p6 = scmp.ne.s32.totalorder %s1977_s18, 0 }
 0x1c8   : > { %v1109_v26 = vld [vmem:[#allocation2] sm:$0xff] (%p1104_p6)  ;;  %v1110_v27 = vld [vmem:[#allocation2 + $0x8] sm:$0xff] (%p1104_p6)  ;;  %v1111_v28 = vld [vmem:[#allocation2 + $0x10] sm:$0xff] (%p1104_p6) }
 0x1c9   : > { %1108 = sbr.rel (!%p1104_p6) target bundleno = 536 (0x218), region = 52  ;;  %v1112_v29 = vld [vmem:[#allocation2 + $0x18] sm:$0xff] (%p1104_p6)  ;;  %v1142_v30 = vadd.f32 (%p1104_p6), %v1110_v27, %v1109_v26  ;;  %v1182_v31 = vmul.f32 (%p1104_p6), %v1109_v26, %v1109_v26  ;;  %v1183_v32 = vmul.f32 (%p1104_p6), %v1110_v27, %v1110_v27  ;;  %v1184_v33 = vmul.f32 (%p1104_p6), %v1111_v28, %v1111_v28  ;;  %v1113_v34 = vld [vmem:[#allocation2 + $0x20] sm:$0xff] (%p1104_p6)  ;;  %v1114_v38 = vld [vmem:[#allocation2 + $0x28] sm:$0xff] (%p1104_p6) }
 0x1ca   : > { %v1185_v36 = vmul.f32 (%p1104_p6), %v1112_v29, %v1112_v29  ;;  %v1186_v40 = vmul.f32 (%p1104_p6), %v1113_v34, %v1113_v34  ;;  %v1115_v42 = vld [vmem:[#allocation2 + $0x30] sm:$0xff] (%p1104_p6)  ;;  %v1187_v44 = vmul.f32 (%p1104_p6), %v1114_v38, %v1114_v38  ;;  %v1116_v46 = vld [vmem:[#allocation2 + $0x38] sm:$0xff] (%p1104_p6)  ;;  %v1117_v50 = vld [vmem:[#allocation2 + $0x40] sm:$0xff] (%p1104_p6) }
 0x1cb   : > { %v1143_v35 = vadd.f32 (%p1104_p6), %v1142_v30, %v1111_v28  ;;  %v1214_v37 = vadd.f32 (%p1104_p6), %v1183_v32, %v1182_v31  ;;  %v1188_v48 = vmul.f32 (%p1104_p6), %v1115_v42, %v1115_v42  ;;  %v1189_v52 = vmul.f32 (%p1104_p6), %v1116_v46, %v1116_v46  ;;  %v1118_v54 = vld [vmem:[#allocation2 + $0x48] sm:$0xff] (%p1104_p6)  ;;  %v1119_v58 = vld [vmem:[#allocation2 + $0x50] sm:$0xff] (%p1104_p6)  ;;  %v1120_v62 = vld [vmem:[#allocation2 + $0x58] sm:$0xff] (%p1104_p6) }
 0x1cc   : > { %v1190_v56 = vmul.f32 (%p1104_p6), %v1117_v50, %v1117_v50  ;;  %v1191_v60 = vmul.f32 (%p1104_p6), %v1118_v54, %v1118_v54  ;;  %v1192_v0 = vmul.f32 (%p1104_p6), %v1119_v58, %v1119_v58  ;;  %v1121_v2 = vld [vmem:[#allocation2 + $0x60] sm:$0xff] (%p1104_p6)  ;;  %v1193_v4 = vmul.f32 (%p1104_p6), %v1120_v62, %v1120_v62  ;;  %v1122_v6 = vld [vmem:[#allocation2 + $0x68] sm:$0xff] (%p1104_p6)  ;;  %v1123_v10 = vld [vmem:[#allocation2 + $0x70] sm:$0xff] (%p1104_p6) }
 0x1cd   : > { %v1144_v39 = vadd.f32 (%p1104_p6), %v1143_v35, %v1112_v29  ;;  %v1215_v41 = vadd.f32 (%p1104_p6), %v1214_v37, %v1184_v33  ;;  %v1194_v8 = vmul.f32 (%p1104_p6), %v1121_v2, %v1121_v2  ;;  %v1195_v12 = vmul.f32 (%p1104_p6), %v1122_v6, %v1122_v6  ;;  %v1124_v14 = vld [vmem:[#allocation2 + $0x78] sm:$0xff] (%p1104_p6)  ;;  %v1125_v18 = vld [vmem:[#allocation2 + $0x80] sm:$0xff] (%p1104_p6)  ;;  %v1126_v22 = vld [vmem:[#allocation2 + $0x88] sm:$0xff] (%p1104_p6) }
 0x1ce   : > { %v1196_v16 = vmul.f32 (%p1104_p6), %v1123_v10, %v1123_v10  ;;  %v1197_v20 = vmul.f32 (%p1104_p6), %v1124_v14, %v1124_v14  ;;  %v1198_v24 = vmul.f32 (%p1104_p6), %v1125_v18, %v1125_v18  ;;  %v1127_v26 = vld [vmem:[#allocation2 + $0x90] sm:$0xff] (%p1104_p6)  ;;  %v1199_v28 = vmul.f32 (%p1104_p6), %v1126_v22, %v1126_v22  ;;  %v1128_v30 = vld [vmem:[#allocation2 + $0x98] sm:$0xff] (%p1104_p6) }
 0x1cf   : > { %v1145_v43 = vadd.f32 (%p1104_p6), %v1144_v39, %v1113_v34  ;;  %v1216_v45 = vadd.f32 (%p1104_p6), %v1215_v41, %v1185_v36  ;;  %v1200_v32 = vmul.f32 (%p1104_p6), %v1127_v26, %v1127_v26  ;;  %v1129_v34 = vld [vmem:[#allocation2 + $0xa0] sm:$0xff] (%p1104_p6)  ;;  %v1201_v36 = vmul.f32 (%p1104_p6), %v1128_v30, %v1128_v30 }
 0x1d1   : > { %v1146_v47 = vadd.f32 %v1145_v43, %v1114_v38  ;;  %v1217_v49 = vadd.f32 %v1216_v45, %v1186_v40  ;;  %v1130_v38 = vld [vmem:[#allocation2 + $0xa8] sm:$0xff]  ;;  %v1202_v40 = vmul.f32 %v1129_v34, %v1129_v34 }
 0x1d3   : > { %v1147_v51 = vadd.f32 %v1146_v47, %v1115_v42  ;;  %v1218_v53 = vadd.f32 %v1217_v49, %v1187_v44  ;;  %v1131_v42 = vld [vmem:[#allocation2 + $0xb0] sm:$0xff]  ;;  %v1203_v44 = vmul.f32 %v1130_v38, %v1130_v38 }
 0x1d5   : > { %v1148_v55 = vadd.f32 %v1147_v51, %v1116_v46  ;;  %v1219_v57 = vadd.f32 %v1218_v53, %v1188_v48  ;;  %v1132_v46 = vld [vmem:[#allocation2 + $0xb8] sm:$0xff]  ;;  %v1204_v48 = vmul.f32 %v1131_v42, %v1131_v42 }
 0x1d7   : > { %v1149_v59 = vadd.f32 %v1148_v55, %v1117_v50  ;;  %v1220_v61 = vadd.f32 %v1219_v57, %v1189_v52  ;;  %v1133_v50 = vld [vmem:[#allocation2 + $0xc0] sm:$0xff]  ;;  %v1205_v52 = vmul.f32 %v1132_v46, %v1132_v46 }
 0x1d9   : > { %v1150_v63 = vadd.f32 %v1149_v59, %v1118_v54  ;;  %v1221_v1 = vadd.f32 %v1220_v61, %v1190_v56  ;;  %v1134_v54 = vld [vmem:[#allocation2 + $0xc8] sm:$0xff]  ;;  %v1206_v56 = vmul.f32 %v1133_v50, %v1133_v50 }
 0x1db   : > { %v1151_v3 = vadd.f32 %v1150_v63, %v1119_v58  ;;  %v1222_v5 = vadd.f32 %v1221_v1, %v1191_v60  ;;  %v1135_v58 = vld [vmem:[#allocation2 + $0xd0] sm:$0xff]  ;;  %v1207_v60 = vmul.f32 %v1134_v54, %v1134_v54 }
 0x1dd   : > { %v1152_v7 = vadd.f32 %v1151_v3, %v1120_v62  ;;  %v1223_v9 = vadd.f32 %v1222_v5, %v1192_v0  ;;  %v1136_v62 = vld [vmem:[#allocation2 + $0xd8] sm:$0xff]  ;;  %v1208_v0 = vmul.f32 %v1135_v58, %v1135_v58 }
 0x1df   : > { %v1153_v11 = vadd.f32 %v1152_v7, %v1121_v2  ;;  %v1224_v13 = vadd.f32 %v1223_v9, %v1193_v4  ;;  %v1137_v2 = vld [vmem:[#allocation2 + $0xe0] sm:$0xff]  ;;  %v1209_v4 = vmul.f32 %v1136_v62, %v1136_v62 }
 0x1e1   : > { %v1154_v15 = vadd.f32 %v1153_v11, %v1122_v6  ;;  %v1225_v17 = vadd.f32 %v1224_v13, %v1194_v8  ;;  %v1138_v6 = vld [vmem:[#allocation2 + $0xe8] sm:$0xff]  ;;  %v1210_v8 = vmul.f32 %v1137_v2, %v1137_v2 }
 0x1e3   : > { %v1155_v19 = vadd.f32 %v1154_v15, %v1123_v10  ;;  %v1226_v21 = vadd.f32 %v1225_v17, %v1195_v12  ;;  %v1139_v10 = vld [vmem:[#allocation2 + $0xf0] sm:$0xff]  ;;  %v1211_v12 = vmul.f32 %v1138_v6, %v1138_v6 }
 0x1e5   : > { %v1156_v23 = vadd.f32 %v1155_v19, %v1124_v14  ;;  %v1227_v25 = vadd.f32 %v1226_v21, %v1196_v16  ;;  %v1140_v14 = vld [vmem:[#allocation2 + $0xf8] sm:$0xff]  ;;  %v1212_v16 = vmul.f32 %v1139_v10, %v1139_v10 }
 0x1e6   : > { %v1213_v19 = vmul.f32 %v1140_v14, %v1140_v14 }
 0x1e7   : > { %v1157_v27 = vadd.f32 %v1156_v23, %v1125_v18  ;;  %v1228_v29 = vadd.f32 %v1227_v25, %v1197_v20 }
 0x1e9   : > { %v1158_v31 = vadd.f32 %v1157_v27, %v1126_v22  ;;  %v1229_v33 = vadd.f32 %v1228_v29, %v1198_v24 }
 0x1eb   : > { %v1159_v35 = vadd.f32 %v1158_v31, %v1127_v26  ;;  %v1230_v37 = vadd.f32 %v1229_v33, %v1199_v28 }
 0x1ed   : > { %v1160_v39 = vadd.f32 %v1159_v35, %v1128_v30  ;;  %v1231_v41 = vadd.f32 %v1230_v37, %v1200_v32  ;;  %v1141_v32 = vld [vmem:[#allocation9] sm:$0x1]  ;;  %v1181_v37 = vld [vmem:[#allocation11] sm:$0x1] }
 0x1ef   : > { %v1161_v43 = vadd.f32 %v1160_v39, %v1129_v34  ;;  %v1232_v45 = vadd.f32 %v1231_v41, %v1201_v36 }
 0x1f1   : > { %v1162_v47 = vadd.f32 %v1161_v43, %v1130_v38  ;;  %v1233_v49 = vadd.f32 %v1232_v45, %v1202_v40 }
 0x1f3   : > { %v1163_v51 = vadd.f32 %v1162_v47, %v1131_v42  ;;  %v1234_v53 = vadd.f32 %v1233_v49, %v1203_v44 }
 0x1f5   : > { %v1164_v55 = vadd.f32 %v1163_v51, %v1132_v46  ;;  %v1235_v57 = vadd.f32 %v1234_v53, %v1204_v48 }
 0x1f7   : > { %v1165_v59 = vadd.f32 %v1164_v55, %v1133_v50  ;;  %v1236_v61 = vadd.f32 %v1235_v57, %v1205_v52 }
 0x1f9   : > { %v1166_v63 = vadd.f32 %v1165_v59, %v1134_v54  ;;  %v1237_v1 = vadd.f32 %v1236_v61, %v1206_v56 }
 0x1fb   : > { %v1167_v3 = vadd.f32 %v1166_v63, %v1135_v58  ;;  %v1238_v5 = vadd.f32 %v1237_v1, %v1207_v60 }
 0x1fd   : > { %v1168_v7 = vadd.f32 %v1167_v3, %v1136_v62  ;;  %v1239_v9 = vadd.f32 %v1238_v5, %v1208_v0 }
 0x1ff   : > { %v1169_v11 = vadd.f32 %v1168_v7, %v1137_v2  ;;  %v1240_v13 = vadd.f32 %v1239_v9, %v1209_v4 }
 0x201   : > { %v1170_v15 = vadd.f32 %v1169_v11, %v1138_v6  ;;  %v1241_v17 = vadd.f32 %v1240_v13, %v1210_v8 }
 0x203   : > { %v1171_v18 = vadd.f32 %v1170_v15, %v1139_v10  ;;  %v1242_v20 = vadd.f32 %v1241_v17, %v1211_v12 }
 0x205   : > { %v1172_v21 = vadd.f32 %v1171_v18, %v1140_v14  ;;  %v1243_v22 = vadd.f32 %v1242_v20, %v1212_v16 }
 0x207   : > { %v1173_v23 = vrot.slane %v1172_v21, 4  ;;  %v1244_v24 = vadd.f32 %v1243_v22, %v1213_v19 }
 0x209   : > { %v1174_v25 = vadd.f32 %v1173_v23, %v1172_v21  ;;  %v1245_v26 = vrot.slane %v1244_v24, 4 }
 0x20b   : > { %v1175_v27 = vrot.slane %v1174_v25, 2  ;;  %v1246_v28 = vadd.f32 %v1245_v26, %v1244_v24 }
 0x20d   : > { %v1176_v29 = vadd.f32 %v1175_v27, %v1174_v25  ;;  %v1247_v30 = vrot.slane %v1246_v28, 2 }
 0x20f   : > { %v1177_v31 = vrot.slane %v1176_v29, 1  ;;  %v1248_v33 = vadd.f32 %v1247_v30, %v1246_v28 }
 0x211   : > { %v1178_v34 = vadd.f32 %v1177_v31, %v1176_v29  ;;  %v1249_v35 = vrot.slane %v1248_v33, 1 }
 0x213   : > { %v1179_v36 = vadd.f32 %v1178_v34, %v1141_v32  ;;  %v1250_v38 = vadd.f32 %v1249_v35, %v1248_v33 }
 0x215   : > { %1180 = vst [vmem:[#allocation9] sm:$0x1] %v1179_v36  ;;  %v1251_v39 = vadd.f32 %v1250_v38, %v1181_v37 }
 0x217   : > { %1252 = vst [vmem:[#allocation11] sm:$0x1] %v1251_v39 }
 0x218 PF: > { %s1993_s25 = smov [#allocation9]   ;;  %s1498_s14 = sshll.u32 %s1977_s18, 12 }
 0x219   : > { %s1284_s27 = sshll.u32 %s1993_s25, 4  ;;  %p2382_p12 = scmp.ne.s32.totalorder %s2370_s24, 0  ;;  %s1285_s27 = int_to_ptr.vmem [resolvable:$true] %s1284_s27 }
 0x21a   : > { %s1843_s22 = scalar_lea.vmem %s1285_s27, 16  ;;  %s1849_s28 = scalar_lea.vmem %s1285_s27, 32 }
 0x21b   : > { %p1844_p8 = scmp.ne.s32.totalorder %s1285_s27, %s1843_s22  ;;  %p1850_p5 = scmp.lt.s32.totalorder %s1285_s27, %s1285_s27 }
 0x21c   : > { %p1851_p9 = scmp.lt.s32.totalorder %s1849_s28, %s1843_s22 }
 0x21d   : > { %p1845_p11 = pnand %p1844_p8, %p2382_p12 }
 0x21e   : > { %p1852_p1 = por %p1851_p9, %p1850_p5 }
 0x21f   : > { %p1846_p0 = pneg %p1845_p11 }
 0x221   : > { %p1853_p2 = pnand %p1852_p1, %p1846_p0 }
 0x223   : > { %1856 = shalt.err (!%p1853_p2)
}
 0x224   : > { %s1857_s11 = scalar_lea.hbm %s2362_s3, 16 }
 0x225   : > { %p1858_p3 = scmp.ne.s32.totalorder %s2362_s3, %s1857_s11  ;;  %p1863_p4 = scmp.lt.u32.totalorder %s1857_s11, %s2362_s3 }
 0x227   : > { %p1859_p7 = pnand %p1858_p3, %p2382_p12 }
 0x229   : > { %p1860_p13 = pneg %p1859_p7 }
 0x22b   : > { %p1865_p6 = pnand %p1863_p4, %p1860_p13 }
 0x22d   : > { %1868 = shalt.err (!%p1865_p6)
}
 0x22e   : > { %1635 = dma.vmem_to_hbm [thread:$0]  (%p2382_p12), %s1285_s27, 16, %s2362_s3, [#allocation10]  }
 0x22f   : > { %s2285_s28 = scalar_lea.hbm %s2361_s2, %s1498_s14  ;;  %s1268_s6 = sshll.u32 %s2226_s23, 4  ;;  %s2288_s6 = int_to_ptr.vmem [resolvable:$true] %s1268_s6 }
 0x230   : > { %s1254_s9 = scalar_lea.sflag [#allocation5], %s2175_s12  ;;  %s1869_s11 = scalar_lea.vmem %s2288_s6, 4096 }
 0x231   : > { %p1870_p8 = scmp.ne.s32.totalorder %s2288_s6, %s1869_s11  ;;  %s1994_s30 = smov [#allocation8]  }
 0x232   : > { %s1873_s7 = sshll.u32 %s1994_s30, 4  ;;  %s1874_s7 = int_to_ptr.vmem [resolvable:$false] %s1873_s7 }
 0x233   : > { %p1871_p11 = pnand %p1870_p8, %p2119_p10  ;;  %s1875_s27 = scalar_lea.vmem %s1874_s7, 8192 }
 0x234   : > { %p1876_p5 = scmp.lt.s32.totalorder %s2288_s6, %s1874_s7  ;;  %p1877_p9 = scmp.lt.s32.totalorder %s1875_s27, %s1869_s11 }
 0x235   : > { %p1872_p0 = pneg %p1871_p11 }
 0x236   : > { %p1878_p1 = por %p1877_p9, %p1876_p5 }
 0x238   : > { %p1879_p2 = pnand %p1878_p1, %p1872_p0 }
 0x23a   : > { %1882 = shalt.err (!%p1879_p2)
}
 0x23b   : > { %s1883_s23 = scalar_lea.hbm %s2285_s28, 4096  ;;  %s1887_s13 = scalar_lea.hbm %s2361_s2, 8192 }
 0x23c   : > { %p1884_p3 = scmp.ne.s32.totalorder %s2285_s28, %s1883_s23  ;;  %p1888_p4 = scmp.lt.u32.totalorder %s2285_s28, %s2361_s2 }
 0x23d   : > { %p1889_p6 = scmp.lt.u32.totalorder %s1887_s13, %s1883_s23  ;;  %p1891_p11 = scmp.lt.u32.totalorder %s1883_s23, %s2285_s28 }
 0x23e   : > { %p1885_p7 = pnand %p1884_p3, %p2119_p10 }
 0x23f   : > { %p1890_p8 = por %p1889_p6, %p1888_p4 }
 0x240   : > { %p1886_p13 = pneg %p1885_p7 }
 0x241   : > { %p1892_p0 = por %p1891_p11, %p1890_p8 }
 0x243   : > { %p1893_p5 = pnand %p1892_p0, %p1886_p13 }
 0x245   : > { %1896 = shalt.err (!%p1893_p5)
}
 0x246   : > { %s1995_s25 = smov 128   ;;  %s1996_s22 = smov 8  }
 0x247   : > { %1633 = dma.vmem_to_hbm [thread:$0]  (%p2119_p10), %s2288_s6, 4096, %s2285_s28, %s1254_s9, %s1995_s25, %s1995_s25, %s1996_s22  }
 0x248   : > { %s1997_s11 = smov [#allocation11]  }
 0x249   : > { %s1297_s30 = sshll.u32 %s1997_s11, 4  ;;  %s1298_s30 = int_to_ptr.vmem [resolvable:$true] %s1297_s30 }
 0x24a   : > { %s1897_s7 = scalar_lea.vmem %s1298_s30, 16  ;;  %s1903_s27 = scalar_lea.vmem %s1298_s30, 32 }
 0x24b   : > { %p1898_p9 = scmp.ne.s32.totalorder %s1298_s30, %s1897_s7  ;;  %p1904_p3 = scmp.lt.s32.totalorder %s1298_s30, %s1298_s30 }
 0x24c   : > { %p1905_p7 = scmp.lt.s32.totalorder %s1903_s27, %s1897_s7 }
 0x24d   : > { %p1899_p1 = pnand %p1898_p9, %p2382_p12 }
 0x24e   : > { %p1906_p13 = por %p1905_p7, %p1904_p3 }
 0x24f   : > { %p1900_p2 = pneg %p1899_p1 }
 0x251   : > { %p1907_p4 = pnand %p1906_p13, %p1900_p2 }
 0x253   : > { %1910 = shalt.err (!%p1907_p4)
}
 0x254   : > { %s1911_s8 = scalar_lea.hbm %s2363_s4, 16 }
 0x255   : > { %p1912_p10 = scmp.ne.s32.totalorder %s2363_s4, %s1911_s8  ;;  %p1917_p11 = scmp.lt.u32.totalorder %s1911_s8, %s2363_s4 }
 0x257   : > { %p1913_p6 = pnand %p1912_p10, %p2382_p12 }
 0x259   : > { %p1914_p8 = pneg %p1913_p6 }
 0x25b   : > { %p1919_p0 = pnand %p1917_p11, %p1914_p8 }
 0x25d   : > { %1922 = shalt.err (!%p1919_p0)
}
 0x25e   : > { %1637 = dma.vmem_to_hbm [thread:$0]  (%p2382_p12), %s1298_s30, 16, %s2363_s4, [#allocation10]  }
 0x25f   : > { %1956 = dma.done.wait (%p2382_p12), [#allocation10], 32  }
 0x260   : > { %1958 = vsyncadd (%p2382_p12), [#allocation10], 4294967264 }
 0x261 PF: > { %s1317_s29 = sand.u32 1, %s1965_s15   ;;  %p2383_p5 = scmp.ne.s32.totalorder %s2372_s26, 0 }
 0x262   : > { %p2384_p9 = scmp.ge.s32.totalorder %s1985_s20, 2  ;;  %s1318_s21 = scalar_lea.sflag [#allocation5], %s1317_s29 }
 0x264   : > { %p1652_p1 = pnand %p2384_p9, %p2383_p5 }
 0x266   : > { %1960 = dma.done.wait (!%p1652_p1), %s1318_s21, 4096  }
 0x267   : > { %1962 = vsyncadd (!%p1652_p1), %s1318_s21, 4294963200  ;;  %s23_s20 = sadd.s32 1, %s1985_s20   ;;  %s2385_s15 = smov %s1969_s16 }
 0x268   : > { %p20_p2 = scmp.ge.s32.totalorder %s23_s20, 4   ;;  %s2386_s16 = smov %s1973_s17 }
 0x269   : > { %s2387_s17 = smov %s2128_s10  ;;  %s2388_s18 = smov %s1981_s19 }
 0x26a   : > { %s2389_s19 = smov %s2391_s5  ;;  %22 = sbr.rel (!%p20_p2) target bundleno = 8 (0x8), region = 112 }
 0x271   :  { %1323 = vsyncpa [#allocation4], 1 }
 0x272   :  { %1325 = vsyncpa [#allocation4 + $0x1], 1 }
 0x273   :  { %1326 = vsyncpa [#allocation7], 1 }
 0x274   :  { %1327 = vsyncpa [#allocation5], 1 }
 0x275   :  { %1329 = vsyncpa [#allocation5 + $0x1], 1 }
 0x276   :  { %1330 = vsyncpa [#allocation10], 1 }

</bundles_post_ra>
